<compile_context>
chip_gen: v7x
topology: tpu7x:2x2x1
jax: 0.10.0
libtpu: 0.0.40
codegen_flags: <defaults>
</compile_context>

<pallas_src>
import jax
import jax.numpy as jnp
from jax.experimental import pallas as pl
from jax.experimental.pallas import tpu as pltpu

# ----------------------------- configuration -----------------------------
SEQLEN, BSZ, MAXLOCS, NFEATS = 8, 2, 3, 4
MAXFIELDS = 5
EMB = 32                       # emb_size
HID = 32                       # hid_size (== srcfieldenc dim for attention)
SZMULT = 2                     # mlp_sz_mult
RNNINSZ = SZMULT * EMB         # 64
L = 4
LP1 = L + 1
K = 3
NFIELDS = 5
ENC = EMB                      # srcfieldenc feature dim
GENTYPES = 50
G1 = GENTYPES + 1              # decoder output width
VOCAB = 100
N = BSZ * SEQLEN               # 16, flattened (b, s)
OH = HID + ENC                 # 64  (out_hid_sz)
V = G1 + NFIELDS               # 56  ([decoder | attention scores])
VPAD = 128                     # lane-dense padded output width (wrapper slices [:V])
H4 = 4 * HID                   # 128 (LSTM gate width)
NEG_INF = float("-inf")


# ----------------------------- Encoder kernel -----------------------------
def _encoder_kernel(srcemb_ref, uniqemb_ref, wsum_ref, sbias_ref, ubias_ref,
                    srcenc_ref, sfe_ref, uniqenc_ref):
    # srcemb: (nfeats, bsz*nfields, emb) ; uniqemb: (maxfields, bsz, emb)
    fe = jnp.sum(srcemb_ref[...], axis=0)                 # sum over feats
    embs = jnp.tanh(fe + sbias_ref[...])                  # (bsz*nfields, emb)
    sfe_ref[...] = embs                                   # srcfieldenc (flattened)
    # srcenc = sum_f avgmask[b,f] * embs[b,f,:]  (avgmask folded into block matrix)
    srcenc_ref[...] = jnp.dot(wsum_ref[...], embs, preferred_element_type=jnp.float32)
    uq = jnp.sum(uniqemb_ref[...], axis=0) + ubias_ref[...]
    uniqenc_ref[...] = jnp.maximum(uq, 0.0)
    # TODO(synk): max_pool=True branch (relu + masked max_pool1d) not implemented
    # for this configuration (Encoder is built with max_pool=False here).


def encoder_forward(params, src, avgmask, uniqfields):
    bsz, nfields, nfeats = src.shape
    maxfields = uniqfields.shape[1]
    # embedding gather is data-dependent -> plain XLA glue; compute stays in Pallas
    src_embs = params["lut"][src.reshape(-1)].reshape(bsz * nfields, nfeats, EMB)
    src_embs = jnp.transpose(src_embs, (1, 0, 2))          # (nfeats, bsz*nfields, emb)
    uniq_embs = params["lut"][uniqfields.reshape(-1)].reshape(bsz, maxfields, EMB)
    uniq_embs = jnp.transpose(uniq_embs, (1, 0, 2))        # (maxfields, bsz, emb)
    # (bsz, bsz*nfields) block matrix holding avgmask on its own batch block
    eye = jnp.eye(bsz, dtype=jnp.float32)
    wsum = (eye[:, :, None] * avgmask[None, :, :]).reshape(bsz, bsz * nfields)

    srcenc, sfe_flat, uniqenc = pl.pallas_call(
        _encoder_kernel,
        out_shape=(jax.ShapeDtypeStruct((bsz, EMB), jnp.float32),
                   jax.ShapeDtypeStruct((bsz * nfields, EMB), jnp.float32),
                   jax.ShapeDtypeStruct((bsz, EMB), jnp.float32)),
    )(src_embs, uniq_embs, wsum, params["src_bias"], params["uniq_bias"])
    return srcenc, sfe_flat.reshape(bsz, nfields, EMB), uniqenc


# ------------------- fused per-state (k) emission kernel -------------------
def _emission_k_kernel(segembs_ref, h0_ref, c0_ref,
                       w_ih_ref, w_hh_ref, b_ref,
                       attg_ref, attb_ref, att2g_ref, att2b_ref,
                       outg_ref, outb_ref,
                       fecat_ref, fetcat_ref, addmask_ref,
                       decw_ref, decb_ref,
                       out_ref):
    # ---- single-layer LSTM over L+1 timesteps (PyTorch gate order i,f,g,o) ----
    # Input-side matmul hoisted out of the recurrent loop: one (LP1*N,RNNINSZ)x(RNNINSZ,4H)
    # MXU push instead of LP1 tiny ones; bias folded in once.
    xg = (jnp.dot(segembs_ref[...], w_ih_ref[0], preferred_element_type=jnp.float32)
          + b_ref[0])                                      # (LP1*N, 4H)
    w_hh = w_hh_ref[0]
    h = h0_ref[...]
    c = c0_ref[...]
    hs = []
    for t in range(LP1):                                   # LP1 is tiny & static
        gates = xg[t * N:(t + 1) * N, :] + jnp.dot(h, w_hh,
                                                   preferred_element_type=jnp.float32)
        i = jax.nn.sigmoid(gates[:, 0 * HID:1 * HID])
        f = jax.nn.sigmoid(gates[:, 1 * HID:2 * HID])
        g = jnp.tanh(gates[:, 2 * HID:3 * HID])
        o = jax.nn.sigmoid(gates[:, 3 * HID:4 * HID])
        c = f * c + i * g
        h = o * jnp.tanh(c)
        hs.append(h)
    states = jnp.concatenate(hs, axis=0)                   # (LP1*N, HID), rows (l, b, s)

    # ---- attention over source fields: both heads + both batches in ONE matmul ----
    a1 = jnp.tanh(states * attg_ref[0] + attb_ref[0])
    a2 = jnp.tanh(states * att2g_ref[0] + att2b_ref[0])
    sc12 = jnp.dot(jnp.concatenate([a1, a2], axis=0), fetcat_ref[...],
                   preferred_element_type=jnp.float32)     # (2*LP1*N, BSZ*NFIELDS)
    sc = sc12[:LP1 * N] + addmask_ref[...]                 # first head (softmaxed)
    sc2 = sc12[LP1 * N:] + addmask_ref[...]                # sep_attn head (raw scores)

    # softmax over the batch-concatenated field axis; the other batch's columns are
    # -inf-masked, so they get probability 0 and probs @ fe_cat is the correct ctx.
    m = jnp.max(sc, axis=-1, keepdims=True)
    e = jnp.exp(sc - m)
    probs = e * pl.reciprocal(jnp.sum(e, axis=-1, keepdims=True), approx=True)
    ctx = jnp.dot(probs, fecat_ref[...], preferred_element_type=jnp.float32)  # (LP1*N, ENC)

    # pick each row's own NFIELDS columns of sc2 (other batch's columns are -inf,
    # so an elementwise max over the two blocks selects the right one).
    asc = jnp.maximum(sc2[:, :NFIELDS], sc2[:, NFIELDS:])  # (LP1*N, NFIELDS)

    # ---- output gating + ONE fused 64-deep decoder matmul + fused log_softmax ----
    outg = outg_ref[0]
    outb = outb_ref[0]
    skh = jnp.tanh(states * outg[:, :HID] + outb[:, :HID])
    skc = jnp.tanh(ctx * outg[:, HID:] + outb[:, HID:])
    dec = (jnp.dot(jnp.concatenate([skh, skc], axis=-1), decw_ref[...],
                   preferred_element_type=jnp.float32) + decb_ref[...])       # (LP1*N, G1)

    # lane-dense 128-wide logits [dec | asc | -inf pad]; pad columns contribute 0 to
    # the log_softmax normalizer and are sliced off in the wrapper.
    pad = jnp.full((LP1 * N, VPAD - V), NEG_INF, jnp.float32)
    full = jnp.concatenate([dec, asc, pad], axis=-1)       # (LP1*N, VPAD)
    m2 = jnp.max(full, axis=-1, keepdims=True)
    lse = m2 + jnp.log(jnp.sum(jnp.exp(full - m2), axis=-1, keepdims=True))
    out_ref[0] = full - lse                                # single full-width store


def emission_scores(segembs, h0, c0, w_ih, w_hh, b_lstm,
                    att_g, att_b, att2_g, att2_b, out_g, out_b,
                    fe_cat, fet_cat, addmask, dec_w, dec_b):
    in_specs = [
        pl.BlockSpec((LP1 * N, RNNINSZ), lambda k: (0, 0)),          # segembs (shared)
        pl.BlockSpec((N, HID), lambda k: (0, 0)),                    # h0
        pl.BlockSpec((N, HID), lambda k: (0, 0)),                    # c0
        pl.BlockSpec((1, RNNINSZ, H4), lambda k: (k, 0, 0)),         # W_ih^T  per-k
        pl.BlockSpec((1, HID, H4), lambda k: (k, 0, 0)),             # W_hh^T  per-k
        pl.BlockSpec((1, 1, H4), lambda k: (k, 0, 0)),               # b_ih+b_hh per-k
        pl.BlockSpec((1, 1, HID), lambda k: (k, 0, 0)),              # state_att_gates[k]
        pl.BlockSpec((1, 1, HID), lambda k: (k, 0, 0)),              # state_att_biases[k]
        pl.BlockSpec((1, 1, HID), lambda k: (k, 0, 0)),              # state_att2_gates[k]
        pl.BlockSpec((1, 1, HID), lambda k: (k, 0, 0)),              # state_att2_biases[k]
        pl.BlockSpec((1, 1, OH), lambda k: (k, 0, 0)),               # state_out_gates[k]
        pl.BlockSpec((1, 1, OH), lambda k: (k, 0, 0)),               # state_out_biases[k]
        pl.BlockSpec((BSZ * NFIELDS, ENC), lambda k: (0, 0)),        # fe_cat (shared)
        pl.BlockSpec((ENC, BSZ * NFIELDS), lambda k: (0, 0)),        # fe_cat^T (shared)
        pl.BlockSpec((LP1 * N, BSZ * NFIELDS), lambda k: (0, 0)),    # additive block mask
        pl.BlockSpec((OH, G1), lambda k: (0, 0)),                    # decoder W^T
        pl.BlockSpec((1, G1), lambda k: (0, 0)),                     # decoder b
    ]
    out_specs = pl.BlockSpec((1, LP1 * N, VPAD), lambda k: (k, 0, 0))
    return pl.pallas_call(
        _emission_k_kernel,
        grid=(K,),
        in_specs=in_specs,
        out_specs=out_specs,
        out_shape=jax.ShapeDtypeStruct((K, LP1 * N, VPAD), jnp.float32),
        compiler_params=pltpu.CompilerParams(dimension_semantics=("parallel",)),
    )(segembs, h0, c0, w_ih, w_hh, b_lstm, att_g, att_b, att2_g, att2_b,
      out_g, out_b, fe_cat, fet_cat, addmask, dec_w, dec_b)


# ----------------------------- parameters -----------------------------
def init_params(key):
    initrange = 0.1
    keys = list(jax.random.split(key, 24))
    it = iter(keys)
    u = lambda k, shape: jax.random.uniform(k, shape, jnp.float32, -initrange, initrange)
    p = {}
    p["lut"] = u(next(it), (VOCAB, EMB))
    p["src_bias"] = u(next(it), (1, EMB))                 # Encoder.src_bias
    p["uniq_bias"] = u(next(it), (1, EMB))                # Encoder.uniq_bias
    p["inpmlp_w"] = u(next(it), (NFEATS * EMB, RNNINSZ))  # stored pre-transposed
    p["inpmlp_b"] = u(next(it), (1, RNNINSZ))
    p["start_emb"] = u(next(it), (1, 1, RNNINSZ))
    p["pad_emb"] = jnp.zeros((1, 1, RNNINSZ), jnp.float32)  # torch.zeros, never re-init'ed
    p["w_ih"] = u(next(it), (K, RNNINSZ, H4))             # per-k LSTM W_ih^T
    p["w_hh"] = u(next(it), (K, HID, H4))                 # per-k LSTM W_hh^T
    p["b_lstm"] = u(next(it), (K, 1, H4))                 # combined b_ih + b_hh
    p["h0_lin_w"] = u(next(it), (EMB, 2 * HID))           # pre-transposed
    p["h0_lin_b"] = u(next(it), (1, 2 * HID))
    p["att_g"] = u(next(it), (K, 1, HID))
    p["att_b"] = u(next(it), (K, 1, HID))
    p["att2_g"] = u(next(it), (K, 1, HID))
    p["att2_b"] = u(next(it), (K, 1, HID))
    p["out_g"] = u(next(it), (K, 1, OH))
    p["out_b"] = u(next(it), (K, 1, OH))
    p["dec_w"] = u(next(it), (OH, G1))                    # pre-transposed
    p["dec_b"] = u(next(it), (1, G1))
    return p


# ----------------------------- emission forward (glue + kernel) -----------------------------
def emission_forward(params, inps, srcenc, srcfieldenc, fieldmask, combotargs):
    seqlen, bsz, maxlocs, nfeats = inps.shape

    # 1) embedding lookup + input MLP + mean over locations -- tiny, so plain XLA glue
    #    (a separate Pallas launch at this size is pure launch/DMA overhead).
    embs = params["lut"][inps.reshape(-1)].reshape(seqlen * bsz * maxlocs, nfeats * EMB)
    mlp = jnp.maximum(embs @ params["inpmlp_w"] + params["inpmlp_b"], 0.0)
    inpembs = mlp.reshape(seqlen, bsz, maxlocs, RNNINSZ).mean(axis=2)   # (seqlen, bsz, ·)

    # 2) to_seg_embs (pad_emb is zeros); flattened rows ordered (l, b, s)
    xemb = jnp.transpose(inpembs, (1, 0, 2))              # (bsz, seqlen, RNNINSZ)
    rows = [jnp.broadcast_to(params["start_emb"], (bsz, seqlen, RNNINSZ)), xemb]
    for i in range(1, L):
        pad = jnp.broadcast_to(params["pad_emb"], (bsz, i, RNNINSZ))
        rows.append(jnp.concatenate([xemb[:, i:], pad], axis=1))
    segembs = jnp.stack(rows).reshape(LP1 * bsz * seqlen, RNNINSZ)

    # 3) initial LSTM state from srcenc (tiny -> plain JAX)
    inits = srcenc @ params["h0_lin_w"] + params["h0_lin_b"]
    h0 = jnp.broadcast_to(jnp.tanh(inits[:, :HID])[:, None, :],
                          (bsz, seqlen, HID)).reshape(N, HID)
    c0 = jnp.broadcast_to(inits[:, HID:][:, None, :],
                          (bsz, seqlen, HID)).reshape(N, HID)

    # 4) batch-concatenated field encodings + additive block mask for fused attention
    fe_cat = srcfieldenc.reshape(bsz * NFIELDS, ENC)
    fet_cat = fe_cat.T
    blocks = []
    for b in range(bsz):
        cols = [jnp.full((seqlen, NFIELDS), NEG_INF, jnp.float32) for _ in range(bsz)]
        cols[b] = jnp.broadcast_to(fieldmask[b], (seqlen, NFIELDS))
        blocks.append(jnp.concatenate(cols, axis=1))
    addmask = jnp.tile(jnp.concatenate(blocks, axis=0), (LP1, 1))  # (LP1*N, bsz*NFIELDS)

    # 5) fused per-k LSTM + attention + output-gate + decoder + log_softmax (Pallas)
    wlps_pad = emission_scores(segembs, h0, c0, params["w_ih"], params["w_hh"],
                               params["b_lstm"], params["att_g"], params["att_b"],
                               params["att2_g"], params["att2_b"], params["out_g"],
                               params["out_b"], fe_cat, fet_cat, addmask,
                               params["dec_w"], params["dec_b"])   # (K, LP1*N, VPAD)
    wlps = wlps_pad[:, :, :V]

    # 6) target gather / segment log-likelihoods (tiny; plain JAX glue)
    neg_inf = jnp.full((K, LP1 * N, 1), -jnp.inf, jnp.float32)   # lse_obj "zeros" column
    wlps_full = jnp.concatenate([wlps, neg_inf], axis=2)         # (K, LP1*N, V+1)
    tgt = jnp.broadcast_to(combotargs.reshape(1, L * N, MAXLOCS), (K, L * N, MAXLOCS))
    psk = jnp.take_along_axis(wlps_full[:, :L * N, :], tgt, axis=2)
    m = jnp.max(psk, axis=2, keepdims=True)                      # logsumexp1(psk)
    m_safe = jnp.where(jnp.isfinite(m), m, 0.0)
    lls = jnp.squeeze(m_safe, 2) + jnp.log(jnp.sum(jnp.exp(psk - m_safe), axis=2))
    seglls = jnp.cumsum(lls.reshape(K, L, N), axis=1)
    eop = wlps_full[:, N:LP1 * N, GENTYPES].reshape(K, L, N)     # eop_idx = gentypes
    seglls = seglls + eop
    # (K, L, bsz, seqlen) -> (L, seqlen, bsz, K)   [Kmul == 1, no repeat]
    return jnp.transpose(seglls.reshape(K, L, bsz, seqlen), (1, 3, 2, 0))

    # TODO(synk): the `ar`/`word_ar` branch (ar_rnn + to_seg_hist) is not exercised
    # (ar=False in this configuration); dropout is a no-op (p=0, eval semantics).


# ----------------------------- full forward -----------------------------
def model_forward(params, src, avgmask, uniqfields, inps, fieldmask, combotargs):
    srcenc, srcfieldenc, uniqenc = encoder_forward(params, src, avgmask, uniqfields)
    obslps = emission_forward(params, inps, srcenc, srcfieldenc, fieldmask, combotargs)
    return obslps, srcenc, srcfieldenc, uniqenc


# ----------------------------- main -----------------------------
if __name__ == "__main__":
    key = jax.random.PRNGKey(0)
    kp, k1, k2, k3, k4 = jax.random.split(key, 5)
    params = init_params(kp)

    inps = jax.random.randint(k1, (SEQLEN, BSZ, MAXLOCS, NFEATS), 0, VOCAB)
    src = jax.random.randint(k2, (BSZ, NFIELDS, NFEATS), 0, VOCAB)
    uniqfields = jax.random.randint(k3, (BSZ, MAXFIELDS), 0, VOCAB)
    combotargs = jax.random.randint(k4, (L, N, MAXLOCS), 0, V)

    # batch 0: all NFIELDS real fields; batch 1: last field is padding
    nreal = jnp.array([NFIELDS, NFIELDS - 1], jnp.float32)
    real = jnp.arange(NFIELDS)[None, :] < nreal[:, None]
    avgmask = jnp.where(real, 1.0 / nreal[:, None], 0.0)        # 1/true_nfields or 0
    fieldmask = jnp.where(real, 0.0, -jnp.inf)                  # -inf at padded fields

    fwd = jax.jit(model_forward)
    obslps, srcenc, srcfieldenc, uniqenc = fwd(params, src, avgmask, uniqfields,
                                               inps, fieldmask, combotargs)
    jax.block_until_ready((obslps, srcenc, srcfieldenc, uniqenc))

    assert obslps.shape == (L, SEQLEN, BSZ, K), obslps.shape
    assert srcenc.shape == (BSZ, EMB), srcenc.shape
    assert srcfieldenc.shape == (BSZ, NFIELDS, EMB), srcfieldenc.shape
    assert uniqenc.shape == (BSZ, EMB), uniqenc.shape
    assert bool(jnp.all(jnp.isfinite(obslps) | (obslps == -jnp.inf)))
    assert bool(jnp.all(jnp.isfinite(srcenc)))
    assert bool(jnp.all(jnp.isfinite(srcfieldenc)))
    assert bool(jnp.all(jnp.isfinite(uniqenc)))
    print("KERNEL_OK")
</pallas_src>

<mosaic_0001>
module attributes {stable_mosaic.version = 11 : i64} {
  func.func @_encoder_kernel(%arg0: memref<4x10x32xf32, #tpu.memory_space<vmem>>, %arg1: memref<5x2x32xf32, #tpu.memory_space<vmem>>, %arg2: memref<2x10xf32, #tpu.memory_space<vmem>>, %arg3: memref<1x32xf32, #tpu.memory_space<vmem>>, %arg4: memref<1x32xf32, #tpu.memory_space<vmem>>, %arg5: memref<2x32xf32, #tpu.memory_space<vmem>>, %arg6: memref<10x32xf32, #tpu.memory_space<vmem>>, %arg7: memref<2x32xf32, #tpu.memory_space<vmem>>) attributes {dimension_semantics = [], scalar_prefetch = 0 : i64, scratch_operands = 0 : i64, tpu.core_type = #tpu.core_type<tc>} {
    %c0 = arith.constant 0 : index
    %c0_0 = arith.constant 0 : index
    %c0_1 = arith.constant 0 : index
    %0 = vector.load %arg0[%c0, %c0_0, %c0_1] : memref<4x10x32xf32, #tpu.memory_space<vmem>>, vector<4x10x32xf32>
    %cst = arith.constant dense<0.000000e+00> : vector<10x32xf32>
    %1 = vector.multi_reduction <add>, %0, %cst [0] : vector<4x10x32xf32> to vector<10x32xf32>
    %c0_2 = arith.constant 0 : index
    %c0_3 = arith.constant 0 : index
    %2 = vector.load %arg3[%c0_2, %c0_3] : memref<1x32xf32, #tpu.memory_space<vmem>>, vector<1x32xf32>
    %3 = vector.broadcast %2 : vector<1x32xf32> to vector<10x32xf32>
    %4 = arith.addf %1, %3 : vector<10x32xf32>
    %5 = math.tanh %4 : vector<10x32xf32>
    %c0_4 = arith.constant 0 : index
    %c0_5 = arith.constant 0 : index
    %6 = vector.load %arg6[%c0_4, %c0_5] : memref<10x32xf32, #tpu.memory_space<vmem>>, vector<10x32xf32>
    tpu.vector_store %arg6[%c0_4, %c0_5], %5 {strides = array<i32>} : memref<10x32xf32, #tpu.memory_space<vmem>>, vector<10x32xf32>,
    %c0_6 = arith.constant 0 : index
    %c0_7 = arith.constant 0 : index
    %7 = vector.load %arg2[%c0_6, %c0_7] : memref<2x10xf32, #tpu.memory_space<vmem>>, vector<2x10xf32>
    %cst_8 = arith.constant dense<0.000000e+00> : vector<2x32xf32>
    %8 = tpu.matmul %7, %5, %cst_8 {dimension_numbers = #tpu.dot_dimension_numbers<[1], [0], [0], [1], [0, 0, 1, 1], [], []>} : vector<2x10xf32>, vector<10x32xf32>, vector<2x32xf32> -> vector<2x32xf32>
    %c0_9 = arith.constant 0 : index
    %c0_10 = arith.constant 0 : index
    %9 = vector.load %arg5[%c0_9, %c0_10] : memref<2x32xf32, #tpu.memory_space<vmem>>, vector<2x32xf32>
    tpu.vector_store %arg5[%c0_9, %c0_10], %8 {strides = array<i32>} : memref<2x32xf32, #tpu.memory_space<vmem>>, vector<2x32xf32>,
    %c0_11 = arith.constant 0 : index
    %c0_12 = arith.constant 0 : index
    %c0_13 = arith.constant 0 : index
    %10 = vector.load %arg1[%c0_11, %c0_12, %c0_13] : memref<5x2x32xf32, #tpu.memory_space<vmem>>, vector<5x2x32xf32>
    %cst_14 = arith.constant dense<0.000000e+00> : vector<2x32xf32>
    %11 = vector.multi_reduction <add>, %10, %cst_14 [0] : vector<5x2x32xf32> to vector<2x32xf32>
    %c0_15 = arith.constant 0 : index
    %c0_16 = arith.constant 0 : index
    %12 = vector.load %arg4[%c0_15, %c0_16] : memref<1x32xf32, #tpu.memory_space<vmem>>, vector<1x32xf32>
    %13 = vector.broadcast %12 : vector<1x32xf32> to vector<2x32xf32>
    %14 = arith.addf %11, %13 : vector<2x32xf32>
    %cst_17 = arith.constant 0.000000e+00 : f32
    %15 = vector.broadcast %cst_17 : f32 to vector<2x32xf32>
    %16 = arith.maximumf %14, %15 : vector<2x32xf32>
    %c0_18 = arith.constant 0 : index
    %c0_19 = arith.constant 0 : index
    %17 = vector.load %arg7[%c0_18, %c0_19] : memref<2x32xf32, #tpu.memory_space<vmem>>, vector<2x32xf32>
    tpu.vector_store %arg7[%c0_18, %c0_19], %16 {strides = array<i32>} : memref<2x32xf32, #tpu.memory_space<vmem>>, vector<2x32xf32>,
    return
  }
}

module attributes {stable_mosaic.version = 11 : i64} {
  func.func @_emission_k_kernel(%arg0: i32, %arg1: memref<80x64xf32, #tpu.memory_space<vmem>>, %arg2: memref<16x32xf32, #tpu.memory_space<vmem>>, %arg3: memref<16x32xf32, #tpu.memory_space<vmem>>, %arg4: memref<1x64x128xf32, #tpu.memory_space<vmem>>, %arg5: memref<1x32x128xf32, #tpu.memory_space<vmem>>, %arg6: memref<1x1x128xf32, #tpu.memory_space<vmem>>, %arg7: memref<1x1x32xf32, #tpu.memory_space<vmem>>, %arg8: memref<1x1x32xf32, #tpu.memory_space<vmem>>, %arg9: memref<1x1x32xf32, #tpu.memory_space<vmem>>, %arg10: memref<1x1x32xf32, #tpu.memory_space<vmem>>, %arg11: memref<1x1x64xf32, #tpu.memory_space<vmem>>, %arg12: memref<1x1x64xf32, #tpu.memory_space<vmem>>, %arg13: memref<10x32xf32, #tpu.memory_space<vmem>>, %arg14: memref<32x10xf32, #tpu.memory_space<vmem>>, %arg15: memref<80x10xf32, #tpu.memory_space<vmem>>, %arg16: memref<64x51xf32, #tpu.memory_space<vmem>>, %arg17: memref<1x51xf32, #tpu.memory_space<vmem>>, %arg18: memref<1x80x128xf32, #tpu.memory_space<vmem>>) attributes {dimension_semantics = [#tpu.dimension_semantics<parallel>], iteration_bounds = array<i64: 3>, scalar_prefetch = 0 : i64, scratch_operands = 0 : i64, tpu.core_type = #tpu.core_type<tc>, window_params = [{pipeline_mode = #tpu.pipeline_mode<synchronous>, transform_indices = @transform_0, window_bounds = array<i64: 80, 64>}, {pipeline_mode = #tpu.pipeline_mode<synchronous>, transform_indices = @transform_1, window_bounds = array<i64: 16, 32>}, {pipeline_mode = #tpu.pipeline_mode<synchronous>, transform_indices = @transform_2, window_bounds = array<i64: 16, 32>}, {transform_indices = @transform_3, window_bounds = array<i64: 1, 64, 128>}, {transform_indices = @transform_4, window_bounds = array<i64: 1, 32, 128>}, {transform_indices = @transform_5, window_bounds = array<i64: 1, 1, 128>}, {transform_indices = @transform_6, window_bounds = array<i64: 1, 1, 32>}, {transform_indices = @transform_7, window_bounds = array<i64: 1, 1, 32>}, {transform_indices = @transform_8, window_bounds = array<i64: 1, 1, 32>}, {transform_indices = @transform_9, window_bounds = array<i64: 1, 1, 32>}, {transform_indices = @transform_10, window_bounds = array<i64: 1, 1, 64>}, {transform_indices = @transform_11, window_bounds = array<i64: 1, 1, 64>}, {pipeline_mode = #tpu.pipeline_mode<synchronous>, transform_indices = @transform_12, window_bounds = array<i64: 10, 32>}, {pipeline_mode = #tpu.pipeline_mode<synchronous>, transform_indices = @transform_13, window_bounds = array<i64: 32, 10>}, {pipeline_mode = #tpu.pipeline_mode<synchronous>, transform_indices = @transform_14, window_bounds = array<i64: 80, 10>}, {pipeline_mode = #tpu.pipeline_mode<synchronous>, transform_indices = @transform_15, window_bounds = array<i64: 64, 51>}, {pipeline_mode = #tpu.pipeline_mode<synchronous>, transform_indices = @transform_16, window_bounds = array<i64: 1, 51>}, {transform_indices = @transform_17, window_bounds = array<i64: 1, 80, 128>}]} {
    %c0 = arith.constant 0 : index
    %c0_0 = arith.constant 0 : index
    %0 = vector.load %arg1[%c0, %c0_0] : memref<80x64xf32, #tpu.memory_space<vmem>>, vector<80x64xf32>
    %c0_1 = arith.constant 0 : index
    %c0_2 = arith.constant 0 : index
    %c0_3 = arith.constant 0 : index
    %1 = vector.load %arg4[%c0_1, %c0_2, %c0_3] : memref<1x64x128xf32, #tpu.memory_space<vmem>>, vector<1x64x128xf32>
    %2 = vector.shape_cast %1 : vector<1x64x128xf32> to vector<64x128xf32>
    %cst = arith.constant dense<0.000000e+00> : vector<80x128xf32>
    %3 = tpu.matmul %0, %2, %cst {dimension_numbers = #tpu.dot_dimension_numbers<[1], [0], [0], [1], [0, 0, 1, 1], [], []>} : vector<80x64xf32>, vector<64x128xf32>, vector<80x128xf32> -> vector<80x128xf32>
    %c0_4 = arith.constant 0 : index
    %c0_5 = arith.constant 0 : index
    %c0_6 = arith.constant 0 : index
    %4 = vector.load %arg6[%c0_4, %c0_5, %c0_6] : memref<1x1x128xf32, #tpu.memory_space<vmem>>, vector<1x1x128xf32>
    %5 = vector.shape_cast %4 : vector<1x1x128xf32> to vector<1x128xf32>
    %6 = vector.broadcast %5 : vector<1x128xf32> to vector<80x128xf32>
    %7 = arith.addf %3, %6 : vector<80x128xf32>
    %c0_7 = arith.constant 0 : index
    %c0_8 = arith.constant 0 : index
    %c0_9 = arith.constant 0 : index
    %8 = vector.load %arg5[%c0_7, %c0_8, %c0_9] : memref<1x32x128xf32, #tpu.memory_space<vmem>>, vector<1x32x128xf32>
    %9 = vector.shape_cast %8 : vector<1x32x128xf32> to vector<32x128xf32>
    %c0_10 = arith.constant 0 : index
    %c0_11 = arith.constant 0 : index
    %10 = vector.load %arg2[%c0_10, %c0_11] : memref<16x32xf32, #tpu.memory_space<vmem>>, vector<16x32xf32>
    %c0_12 = arith.constant 0 : index
    %c0_13 = arith.constant 0 : index
    %11 = vector.load %arg3[%c0_12, %c0_13] : memref<16x32xf32, #tpu.memory_space<vmem>>, vector<16x32xf32>
    %12 = vector.extract_strided_slice %7 {offsets = [0, 0], sizes = [16, 128], strides = [1, 1]} : vector<80x128xf32> to vector<16x128xf32>
    %cst_14 = arith.constant dense<0.000000e+00> : vector<16x128xf32>
    %13 = tpu.matmul %10, %9, %cst_14 {dimension_numbers = #tpu.dot_dimension_numbers<[1], [0], [0], [1], [0, 0, 1, 1], [], []>} : vector<16x32xf32>, vector<32x128xf32>, vector<16x128xf32> -> vector<16x128xf32>
    %14 = arith.addf %12, %13 : vector<16x128xf32>
    %15 = vector.extract_strided_slice %14 {offsets = [0, 0], sizes = [16, 32], strides = [1, 1]} : vector<16x128xf32> to vector<16x32xf32>
    %16 = arith.negf %15 : vector<16x32xf32>
    %17 = math.exp %16 : vector<16x32xf32>
    %cst_15 = arith.constant 1.000000e+00 : f32
    %18 = vector.broadcast %cst_15 : f32 to vector<16x32xf32>
    %19 = arith.addf %18, %17 : vector<16x32xf32>
    %20 = arith.divf %18, %19 : vector<16x32xf32>
    %21 = vector.extract_strided_slice %14 {offsets = [0, 32], sizes = [16, 32], strides = [1, 1]} : vector<16x128xf32> to vector<16x32xf32>
    %22 = arith.negf %21 : vector<16x32xf32>
    %23 = math.exp %22 : vector<16x32xf32>
    %cst_16 = arith.constant 1.000000e+00 : f32
    %24 = vector.broadcast %cst_16 : f32 to vector<16x32xf32>
    %25 = arith.addf %24, %23 : vector<16x32xf32>
    %26 = arith.divf %24, %25 : vector<16x32xf32>
    %27 = vector.extract_strided_slice %14 {offsets = [0, 64], sizes = [16, 32], strides = [1, 1]} : vector<16x128xf32> to vector<16x32xf32>
    %28 = math.tanh %27 : vector<16x32xf32>
    %29 = vector.extract_strided_slice %14 {offsets = [0, 96], sizes = [16, 32], strides = [1, 1]} : vector<16x128xf32> to vector<16x32xf32>
    %30 = arith.negf %29 : vector<16x32xf32>
    %31 = math.exp %30 : vector<16x32xf32>
    %cst_17 = arith.constant 1.000000e+00 : f32
    %32 = vector.broadcast %cst_17 : f32 to vector<16x32xf32>
    %33 = arith.addf %32, %31 : vector<16x32xf32>
    %34 = arith.divf %32, %33 : vector<16x32xf32>
    %35 = arith.mulf %26, %11 : vector<16x32xf32>
    %36 = arith.mulf %20, %28 : vector<16x32xf32>
    %37 = arith.addf %35, %36 : vector<16x32xf32>
    %38 = math.tanh %37 : vector<16x32xf32>
    %39 = arith.mulf %34, %38 : vector<16x32xf32>
    %40 = vector.extract_strided_slice %7 {offsets = [16, 0], sizes = [16, 128], strides = [1, 1]} : vector<80x128xf32> to vector<16x128xf32>
    %cst_18 = arith.constant dense<0.000000e+00> : vector<16x128xf32>
    %41 = tpu.matmul %39, %9, %cst_18 {dimension_numbers = #tpu.dot_dimension_numbers<[1], [0], [0], [1], [0, 0, 1, 1], [], []>} : vector<16x32xf32>, vector<32x128xf32>, vector<16x128xf32> -> vector<16x128xf32>
    %42 = arith.addf %40, %41 : vector<16x128xf32>
    %43 = vector.extract_strided_slice %42 {offsets = [0, 0], sizes = [16, 32], strides = [1, 1]} : vector<16x128xf32> to vector<16x32xf32>
    %44 = arith.negf %43 : vector<16x32xf32>
    %45 = math.exp %44 : vector<16x32xf32>
    %cst_19 = arith.constant 1.000000e+00 : f32
    %46 = vector.broadcast %cst_19 : f32 to vector<16x32xf32>
    %47 = arith.addf %46, %45 : vector<16x32xf32>
    %48 = arith.divf %46, %47 : vector<16x32xf32>
    %49 = vector.extract_strided_slice %42 {offsets = [0, 32], sizes = [16, 32], strides = [1, 1]} : vector<16x128xf32> to vector<16x32xf32>
    %50 = arith.negf %49 : vector<16x32xf32>
    %51 = math.exp %50 : vector<16x32xf32>
    %cst_20 = arith.constant 1.000000e+00 : f32
    %52 = vector.broadcast %cst_20 : f32 to vector<16x32xf32>
    %53 = arith.addf %52, %51 : vector<16x32xf32>
    %54 = arith.divf %52, %53 : vector<16x32xf32>
    %55 = vector.extract_strided_slice %42 {offsets = [0, 64], sizes = [16, 32], strides = [1, 1]} : vector<16x128xf32> to vector<16x32xf32>
    %56 = math.tanh %55 : vector<16x32xf32>
    %57 = vector.extract_strided_slice %42 {offsets = [0, 96], sizes = [16, 32], strides = [1, 1]} : vector<16x128xf32> to vector<16x32xf32>
    %58 = arith.negf %57 : vector<16x32xf32>
    %59 = math.exp %58 : vector<16x32xf32>
    %cst_21 = arith.constant 1.000000e+00 : f32
    %60 = vector.broadcast %cst_21 : f32 to vector<16x32xf32>
    %61 = arith.addf %60, %59 : vector<16x32xf32>
    %62 = arith.divf %60, %61 : vector<16x32xf32>
    %63 = arith.mulf %54, %37 : vector<16x32xf32>
    %64 = arith.mulf %48, %56 : vector<16x32xf32>
    %65 = arith.addf %63, %64 : vector<16x32xf32>
    %66 = math.tanh %65 : vector<16x32xf32>
    %67 = arith.mulf %62, %66 : vector<16x32xf32>
    %68 = vector.extract_strided_slice %7 {offsets = [32, 0], sizes = [16, 128], strides = [1, 1]} : vector<80x128xf32> to vector<16x128xf32>
    %cst_22 = arith.constant dense<0.000000e+00> : vector<16x128xf32>
    %69 = tpu.matmul %67, %9, %cst_22 {dimension_numbers = #tpu.dot_dimension_numbers<[1], [0], [0], [1], [0, 0, 1, 1], [], []>} : vector<16x32xf32>, vector<32x128xf32>, vector<16x128xf32> -> vector<16x128xf32>
    %70 = arith.addf %68, %69 : vector<16x128xf32>
    %71 = vector.extract_strided_slice %70 {offsets = [0, 0], sizes = [16, 32], strides = [1, 1]} : vector<16x128xf32> to vector<16x32xf32>
    %72 = arith.negf %71 : vector<16x32xf32>
    %73 = math.exp %72 : vector<16x32xf32>
    %cst_23 = arith.constant 1.000000e+00 : f32
    %74 = vector.broadcast %cst_23 : f32 to vector<16x32xf32>
    %75 = arith.addf %74, %73 : vector<16x32xf32>
    %76 = arith.divf %74, %75 : vector<16x32xf32>
    %77 = vector.extract_strided_slice %70 {offsets = [0, 32], sizes = [16, 32], strides = [1, 1]} : vector<16x128xf32> to vector<16x32xf32>
    %78 = arith.negf %77 : vector<16x32xf32>
    %79 = math.exp %78 : vector<16x32xf32>
    %cst_24 = arith.constant 1.000000e+00 : f32
    %80 = vector.broadcast %cst_24 : f32 to vector<16x32xf32>
    %81 = arith.addf %80, %79 : vector<16x32xf32>
    %82 = arith.divf %80, %81 : vector<16x32xf32>
    %83 = vector.extract_strided_slice %70 {offsets = [0, 64], sizes = [16, 32], strides = [1, 1]} : vector<16x128xf32> to vector<16x32xf32>
    %84 = math.tanh %83 : vector<16x32xf32>
    %85 = vector.extract_strided_slice %70 {offsets = [0, 96], sizes = [16, 32], strides = [1, 1]} : vector<16x128xf32> to vector<16x32xf32>
    %86 = arith.negf %85 : vector<16x32xf32>
    %87 = math.exp %86 : vector<16x32xf32>
    %cst_25 = arith.constant 1.000000e+00 : f32
    %88 = vector.broadcast %cst_25 : f32 to vector<16x32xf32>
    %89 = arith.addf %88, %87 : vector<16x32xf32>
    %90 = arith.divf %88, %89 : vector<16x32xf32>
    %91 = arith.mulf %82, %65 : vector<16x32xf32>
    %92 = arith.mulf %76, %84 : vector<16x32xf32>
    %93 = arith.addf %91, %92 : vector<16x32xf32>
    %94 = math.tanh %93 : vector<16x32xf32>
    %95 = arith.mulf %90, %94 : vector<16x32xf32>
    %96 = vector.extract_strided_slice %7 {offsets = [48, 0], sizes = [16, 128], strides = [1, 1]} : vector<80x128xf32> to vector<16x128xf32>
    %cst_26 = arith.constant dense<0.000000e+00> : vector<16x128xf32>
    %97 = tpu.matmul %95, %9, %cst_26 {dimension_numbers = #tpu.dot_dimension_numbers<[1], [0], [0], [1], [0, 0, 1, 1], [], []>} : vector<16x32xf32>, vector<32x128xf32>, vector<16x128xf32> -> vector<16x128xf32>
    %98 = arith.addf %96, %97 : vector<16x128xf32>
    %99 = vector.extract_strided_slice %98 {offsets = [0, 0], sizes = [16, 32], strides = [1, 1]} : vector<16x128xf32> to vector<16x32xf32>
    %100 = arith.negf %99 : vector<16x32xf32>
    %101 = math.exp %100 : vector<16x32xf32>
    %cst_27 = arith.constant 1.000000e+00 : f32
    %102 = vector.broadcast %cst_27 : f32 to vector<16x32xf32>
    %103 = arith.addf %102, %101 : vector<16x32xf32>
    %104 = arith.divf %102, %103 : vector<16x32xf32>
    %105 = vector.extract_strided_slice %98 {offsets = [0, 32], sizes = [16, 32], strides = [1, 1]} : vector<16x128xf32> to vector<16x32xf32>
    %106 = arith.negf %105 : vector<16x32xf32>
    %107 = math.exp %106 : vector<16x32xf32>
    %cst_28 = arith.constant 1.000000e+00 : f32
    %108 = vector.broadcast %cst_28 : f32 to vector<16x32xf32>
    %109 = arith.addf %108, %107 : vector<16x32xf32>
    %110 = arith.divf %108, %109 : vector<16x32xf32>
    %111 = vector.extract_strided_slice %98 {offsets = [0, 64], sizes = [16, 32], strides = [1, 1]} : vector<16x128xf32> to vector<16x32xf32>
    %112 = math.tanh %111 : vector<16x32xf32>
    %113 = vector.extract_strided_slice %98 {offsets = [0, 96], sizes = [16, 32], strides = [1, 1]} : vector<16x128xf32> to vector<16x32xf32>
    %114 = arith.negf %113 : vector<16x32xf32>
    %115 = math.exp %114 : vector<16x32xf32>
    %cst_29 = arith.constant 1.000000e+00 : f32
    %116 = vector.broadcast %cst_29 : f32 to vector<16x32xf32>
    %117 = arith.addf %116, %115 : vector<16x32xf32>
    %118 = arith.divf %116, %117 : vector<16x32xf32>
    %119 = arith.mulf %110, %93 : vector<16x32xf32>
    %120 = arith.mulf %104, %112 : vector<16x32xf32>
    %121 = arith.addf %119, %120 : vector<16x32xf32>
    %122 = math.tanh %121 : vector<16x32xf32>
    %123 = arith.mulf %118, %122 : vector<16x32xf32>
    %124 = vector.extract_strided_slice %7 {offsets = [64, 0], sizes = [16, 128], strides = [1, 1]} : vector<80x128xf32> to vector<16x128xf32>
    %cst_30 = arith.constant dense<0.000000e+00> : vector<16x128xf32>
    %125 = tpu.matmul %123, %9, %cst_30 {dimension_numbers = #tpu.dot_dimension_numbers<[1], [0], [0], [1], [0, 0, 1, 1], [], []>} : vector<16x32xf32>, vector<32x128xf32>, vector<16x128xf32> -> vector<16x128xf32>
    %126 = arith.addf %124, %125 : vector<16x128xf32>
    %127 = vector.extract_strided_slice %126 {offsets = [0, 0], sizes = [16, 32], strides = [1, 1]} : vector<16x128xf32> to vector<16x32xf32>
    %128 = arith.negf %127 : vector<16x32xf32>
    %129 = math.exp %128 : vector<16x32xf32>
    %cst_31 = arith.constant 1.000000e+00 : f32
    %130 = vector.broadcast %cst_31 : f32 to vector<16x32xf32>
    %131 = arith.addf %130, %129 : vector<16x32xf32>
    %132 = arith.divf %130, %131 : vector<16x32xf32>
    %133 = vector.extract_strided_slice %126 {offsets = [0, 32], sizes = [16, 32], strides = [1, 1]} : vector<16x128xf32> to vector<16x32xf32>
    %134 = arith.negf %133 : vector<16x32xf32>
    %135 = math.exp %134 : vector<16x32xf32>
    %cst_32 = arith.constant 1.000000e+00 : f32
    %136 = vector.broadcast %cst_32 : f32 to vector<16x32xf32>
    %137 = arith.addf %136, %135 : vector<16x32xf32>
    %138 = arith.divf %136, %137 : vector<16x32xf32>
    %139 = vector.extract_strided_slice %126 {offsets = [0, 64], sizes = [16, 32], strides = [1, 1]} : vector<16x128xf32> to vector<16x32xf32>
    %140 = math.tanh %139 : vector<16x32xf32>
    %141 = vector.extract_strided_slice %126 {offsets = [0, 96], sizes = [16, 32], strides = [1, 1]} : vector<16x128xf32> to vector<16x32xf32>
    %142 = arith.negf %141 : vector<16x32xf32>
    %143 = math.exp %142 : vector<16x32xf32>
    %cst_33 = arith.constant 1.000000e+00 : f32
    %144 = vector.broadcast %cst_33 : f32 to vector<16x32xf32>
    %145 = arith.addf %144, %143 : vector<16x32xf32>
    %146 = arith.divf %144, %145 : vector<16x32xf32>
    %147 = arith.mulf %138, %121 : vector<16x32xf32>
    %148 = arith.mulf %132, %140 : vector<16x32xf32>
    %149 = arith.addf %147, %148 : vector<16x32xf32>
    %150 = math.tanh %149 : vector<16x32xf32>
    %151 = arith.mulf %146, %150 : vector<16x32xf32>
    %152 = tpu.concatenate %39, %67, %95, %123, %151 in 0 : vector<16x32xf32>, vector<16x32xf32>, vector<16x32xf32>, vector<16x32xf32>, vector<16x32xf32> -> vector<80x32xf32>
    %c0_34 = arith.constant 0 : index
    %c0_35 = arith.constant 0 : index
    %c0_36 = arith.constant 0 : index
    %153 = vector.load %arg7[%c0_34, %c0_35, %c0_36] : memref<1x1x32xf32, #tpu.memory_space<vmem>>, vector<1x1x32xf32>
    %154 = vector.shape_cast %153 : vector<1x1x32xf32> to vector<1x32xf32>
    %155 = vector.broadcast %154 : vector<1x32xf32> to vector<80x32xf32>
    %156 = arith.mulf %152, %155 : vector<80x32xf32>
    %c0_37 = arith.constant 0 : index
    %c0_38 = arith.constant 0 : index
    %c0_39 = arith.constant 0 : index
    %157 = vector.load %arg8[%c0_37, %c0_38, %c0_39] : memref<1x1x32xf32, #tpu.memory_space<vmem>>, vector<1x1x32xf32>
    %158 = vector.shape_cast %157 : vector<1x1x32xf32> to vector<1x32xf32>
    %159 = vector.broadcast %158 : vector<1x32xf32> to vector<80x32xf32>
    %160 = arith.addf %156, %159 : vector<80x32xf32>
    %161 = math.tanh %160 : vector<80x32xf32>
    %c0_40 = arith.constant 0 : index
    %c0_41 = arith.constant 0 : index
    %c0_42 = arith.constant 0 : index
    %162 = vector.load %arg9[%c0_40, %c0_41, %c0_42] : memref<1x1x32xf32, #tpu.memory_space<vmem>>, vector<1x1x32xf32>
    %163 = vector.shape_cast %162 : vector<1x1x32xf32> to vector<1x32xf32>
    %164 = vector.broadcast %163 : vector<1x32xf32> to vector<80x32xf32>
    %165 = arith.mulf %152, %164 : vector<80x32xf32>
    %c0_43 = arith.constant 0 : index
    %c0_44 = arith.constant 0 : index
    %c0_45 = arith.constant 0 : index
    %166 = vector.load %arg10[%c0_43, %c0_44, %c0_45] : memref<1x1x32xf32, #tpu.memory_space<vmem>>, vector<1x1x32xf32>
    %167 = vector.shape_cast %166 : vector<1x1x32xf32> to vector<1x32xf32>
    %168 = vector.broadcast %167 : vector<1x32xf32> to vector<80x32xf32>
    %169 = arith.addf %165, %168 : vector<80x32xf32>
    %170 = math.tanh %169 : vector<80x32xf32>
    %171 = tpu.concatenate %161, %170 in 0 : vector<80x32xf32>, vector<80x32xf32> -> vector<160x32xf32>
    %c0_46 = arith.constant 0 : index
    %c0_47 = arith.constant 0 : index
    %172 = vector.load %arg14[%c0_46, %c0_47] : memref<32x10xf32, #tpu.memory_space<vmem>>, vector<32x10xf32>
    %cst_48 = arith.constant dense<0.000000e+00> : vector<160x10xf32>
    %173 = tpu.matmul %171, %172, %cst_48 {dimension_numbers = #tpu.dot_dimension_numbers<[1], [0], [0], [1], [0, 0, 1, 1], [], []>} : vector<160x32xf32>, vector<32x10xf32>, vector<160x10xf32> -> vector<160x10xf32>
    %174 = vector.extract_strided_slice %173 {offsets = [0, 0], sizes = [80, 10], strides = [1, 1]} : vector<160x10xf32> to vector<80x10xf32>
    %c0_49 = arith.constant 0 : index
    %c0_50 = arith.constant 0 : index
    %175 = vector.load %arg15[%c0_49, %c0_50] : memref<80x10xf32, #tpu.memory_space<vmem>>, vector<80x10xf32>
    %176 = arith.addf %174, %175 : vector<80x10xf32>
    %177 = vector.extract_strided_slice %173 {offsets = [80, 0], sizes = [80, 10], strides = [1, 1]} : vector<160x10xf32> to vector<80x10xf32>
    %c0_51 = arith.constant 0 : index
    %c0_52 = arith.constant 0 : index
    %178 = vector.load %arg15[%c0_51, %c0_52] : memref<80x10xf32, #tpu.memory_space<vmem>>, vector<80x10xf32>
    %179 = arith.addf %177, %178 : vector<80x10xf32>
    %cst_53 = arith.constant dense<0xFF800000> : vector<80xf32>
    %180 = vector.multi_reduction <maximumf>, %176, %cst_53 [1] : vector<80x10xf32> to vector<80xf32>
    %181 = vector.shape_cast %180 : vector<80xf32> to vector<80x1xf32>
    %182 = vector.broadcast %181 : vector<80x1xf32> to vector<80x10xf32>
    %183 = arith.subf %176, %182 : vector<80x10xf32>
    %184 = math.exp %183 : vector<80x10xf32>
    %cst_54 = arith.constant dense<0.000000e+00> : vector<80xf32>
    %185 = vector.multi_reduction <add>, %184, %cst_54 [1] : vector<80x10xf32> to vector<80xf32>
    %186 = vector.shape_cast %185 : vector<80xf32> to vector<80x1xf32>
    %187 = tpu.reciprocal %186 {approx = true} : vector<80x1xf32> -> vector<80x1xf32>
    %188 = vector.broadcast %187 : vector<80x1xf32> to vector<80x10xf32>
    %189 = arith.mulf %184, %188 : vector<80x10xf32>
    %c0_55 = arith.constant 0 : index
    %c0_56 = arith.constant 0 : index
    %190 = vector.load %arg13[%c0_55, %c0_56] : memref<10x32xf32, #tpu.memory_space<vmem>>, vector<10x32xf32>
    %cst_57 = arith.constant dense<0.000000e+00> : vector<80x32xf32>
    %191 = tpu.matmul %189, %190, %cst_57 {dimension_numbers = #tpu.dot_dimension_numbers<[1], [0], [0], [1], [0, 0, 1, 1], [], []>} : vector<80x10xf32>, vector<10x32xf32>, vector<80x32xf32> -> vector<80x32xf32>
    %192 = vector.extract_strided_slice %179 {offsets = [0, 0], sizes = [80, 5], strides = [1, 1]} : vector<80x10xf32> to vector<80x5xf32>
    %193 = vector.extract_strided_slice %179 {offsets = [0, 5], sizes = [80, 5], strides = [1, 1]} : vector<80x10xf32> to vector<80x5xf32>
    %194 = arith.maximumf %192, %193 : vector<80x5xf32>
    %c0_58 = arith.constant 0 : index
    %c0_59 = arith.constant 0 : index
    %c0_60 = arith.constant 0 : index
    %195 = vector.load %arg11[%c0_58, %c0_59, %c0_60] : memref<1x1x64xf32, #tpu.memory_space<vmem>>, vector<1x1x64xf32>
    %196 = vector.shape_cast %195 : vector<1x1x64xf32> to vector<1x64xf32>
    %c0_61 = arith.constant 0 : index
    %c0_62 = arith.constant 0 : index
    %c0_63 = arith.constant 0 : index
    %197 = vector.load %arg12[%c0_61, %c0_62, %c0_63] : memref<1x1x64xf32, #tpu.memory_space<vmem>>, vector<1x1x64xf32>
    %198 = vector.shape_cast %197 : vector<1x1x64xf32> to vector<1x64xf32>
    %199 = vector.extract_strided_slice %196 {offsets = [0, 0], sizes = [1, 32], strides = [1, 1]} : vector<1x64xf32> to vector<1x32xf32>
    %200 = vector.broadcast %199 : vector<1x32xf32> to vector<80x32xf32>
    %201 = arith.mulf %152, %200 : vector<80x32xf32>
    %202 = vector.extract_strided_slice %198 {offsets = [0, 0], sizes = [1, 32], strides = [1, 1]} : vector<1x64xf32> to vector<1x32xf32>
    %203 = vector.broadcast %202 : vector<1x32xf32> to vector<80x32xf32>
    %204 = arith.addf %201, %203 : vector<80x32xf32>
    %205 = math.tanh %204 : vector<80x32xf32>
    %206 = vector.extract_strided_slice %196 {offsets = [0, 32], sizes = [1, 32], strides = [1, 1]} : vector<1x64xf32> to vector<1x32xf32>
    %207 = vector.broadcast %206 : vector<1x32xf32> to vector<80x32xf32>
    %208 = arith.mulf %191, %207 : vector<80x32xf32>
    %209 = vector.extract_strided_slice %198 {offsets = [0, 32], sizes = [1, 32], strides = [1, 1]} : vector<1x64xf32> to vector<1x32xf32>
    %210 = vector.broadcast %209 : vector<1x32xf32> to vector<80x32xf32>
    %211 = arith.addf %208, %210 : vector<80x32xf32>
    %212 = math.tanh %211 : vector<80x32xf32>
    %213 = tpu.concatenate %205, %212 in 1 : vector<80x32xf32>, vector<80x32xf32> -> vector<80x64xf32>
    %c0_64 = arith.constant 0 : index
    %c0_65 = arith.constant 0 : index
    %214 = vector.load %arg16[%c0_64, %c0_65] : memref<64x51xf32, #tpu.memory_space<vmem>>, vector<64x51xf32>
    %cst_66 = arith.constant dense<0.000000e+00> : vector<80x51xf32>
    %215 = tpu.matmul %213, %214, %cst_66 {dimension_numbers = #tpu.dot_dimension_numbers<[1], [0], [0], [1], [0, 0, 1, 1], [], []>} : vector<80x64xf32>, vector<64x51xf32>, vector<80x51xf32> -> vector<80x51xf32>
    %c0_67 = arith.constant 0 : index
    %c0_68 = arith.constant 0 : index
    %216 = vector.load %arg17[%c0_67, %c0_68] : memref<1x51xf32, #tpu.memory_space<vmem>>, vector<1x51xf32>
    %217 = vector.broadcast %216 : vector<1x51xf32> to vector<80x51xf32>
    %218 = arith.addf %215, %217 : vector<80x51xf32>
    %cst_69 = arith.constant 0xFF800000 : f32
    %219 = vector.broadcast %cst_69 : f32 to vector<80x72xf32>
    %220 = tpu.concatenate %218, %194, %219 in 1 : vector<80x51xf32>, vector<80x5xf32>, vector<80x72xf32> -> vector<80x128xf32>
    %cst_70 = arith.constant dense<0xFF800000> : vector<80xf32>
    %221 = vector.multi_reduction <maximumf>, %220, %cst_70 [1] : vector<80x128xf32> to vector<80xf32>
    %222 = vector.shape_cast %221 : vector<80xf32> to vector<80x1xf32>
    %223 = vector.broadcast %222 : vector<80x1xf32> to vector<80x128xf32>
    %224 = arith.subf %220, %223 : vector<80x128xf32>
    %225 = math.exp %224 : vector<80x128xf32>
    %cst_71 = arith.constant dense<0.000000e+00> : vector<80xf32>
    %226 = vector.multi_reduction <add>, %225, %cst_71 [1] : vector<80x128xf32> to vector<80xf32>
    %227 = vector.shape_cast %226 : vector<80xf32> to vector<80x1xf32>
    %228 = math.log %227 : vector<80x1xf32>
    %229 = arith.addf %222, %228 : vector<80x1xf32>
    %230 = vector.broadcast %229 : vector<80x1xf32> to vector<80x128xf32>
    %231 = arith.subf %220, %230 : vector<80x128xf32>
    %c0_72 = arith.constant 0 : index
    %c0_73 = arith.constant 0 : index
    %c0_74 = arith.constant 0 : index
    %232 = vector.load %arg18[%c0_72, %c0_73, %c0_74] : memref<1x80x128xf32, #tpu.memory_space<vmem>>, vector<1x80x128xf32>
    %233 = vector.shape_cast %232 : vector<1x80x128xf32> to vector<80x128xf32>
    %234 = vector.shape_cast %231 : vector<80x128xf32> to vector<1x80x128xf32>
    tpu.vector_store %arg18[%c0_72, %c0_73, %c0_74], %234 {strides = array<i32>} : memref<1x80x128xf32, #tpu.memory_space<vmem>>, vector<1x80x128xf32>,
    return
  }
  func.func @transform_0(%arg0: i32) -> (i32, i32) {
    %c0_i32 = arith.constant 0 : i32
    %c0_i32_0 = arith.constant 0 : i32
    %c0_i32_1 = arith.constant 0 : i32
    return %c0_i32, %c0_i32_0 : i32, i32
  }
  func.func @transform_1(%arg0: i32) -> (i32, i32) {
    %c0_i32 = arith.constant 0 : i32
    %c0_i32_0 = arith.constant 0 : i32
    %c0_i32_1 = arith.constant 0 : i32
    return %c0_i32, %c0_i32_0 : i32, i32
  }
  func.func @transform_2(%arg0: i32) -> (i32, i32) {
    %c0_i32 = arith.constant 0 : i32
    %c0_i32_0 = arith.constant 0 : i32
    %c0_i32_1 = arith.constant 0 : i32
    return %c0_i32, %c0_i32_0 : i32, i32
  }
  func.func @transform_3(%arg0: i32) -> (i32, i32, i32) {
    %c0_i32 = arith.constant 0 : i32
    %c0_i32_0 = arith.constant 0 : i32
    %c0_i32_1 = arith.constant 0 : i32
    return %arg0, %c0_i32, %c0_i32_0 : i32, i32, i32
  }
  func.func @transform_4(%arg0: i32) -> (i32, i32, i32) {
    %c0_i32 = arith.constant 0 : i32
    %c0_i32_0 = arith.constant 0 : i32
    %c0_i32_1 = arith.constant 0 : i32
    return %arg0, %c0_i32, %c0_i32_0 : i32, i32, i32
  }
  func.func @transform_5(%arg0: i32) -> (i32, i32, i32) {
    %c0_i32 = arith.constant 0 : i32
    %c0_i32_0 = arith.constant 0 : i32
    %c0_i32_1 = arith.constant 0 : i32
    return %arg0, %c0_i32, %c0_i32_0 : i32, i32, i32
  }
  func.func @transform_6(%arg0: i32) -> (i32, i32, i32) {
    %c0_i32 = arith.constant 0 : i32
    %c0_i32_0 = arith.constant 0 : i32
    %c0_i32_1 = arith.constant 0 : i32
    return %arg0, %c0_i32, %c0_i32_0 : i32, i32, i32
  }
  func.func @transform_7(%arg0: i32) -> (i32, i32, i32) {
    %c0_i32 = arith.constant 0 : i32
    %c0_i32_0 = arith.constant 0 : i32
    %c0_i32_1 = arith.constant 0 : i32
    return %arg0, %c0_i32, %c0_i32_0 : i32, i32, i32
  }
  func.func @transform_8(%arg0: i32) -> (i32, i32, i32) {
    %c0_i32 = arith.constant 0 : i32
    %c0_i32_0 = arith.constant 0 : i32
    %c0_i32_1 = arith.constant 0 : i32
    return %arg0, %c0_i32, %c0_i32_0 : i32, i32, i32
  }
  func.func @transform_9(%arg0: i32) -> (i32, i32, i32) {
    %c0_i32 = arith.constant 0 : i32
    %c0_i32_0 = arith.constant 0 : i32
    %c0_i32_1 = arith.constant 0 : i32
    return %arg0, %c0_i32, %c0_i32_0 : i32, i32, i32
  }
  func.func @transform_10(%arg0: i32) -> (i32, i32, i32) {
    %c0_i32 = arith.constant 0 : i32
    %c0_i32_0 = arith.constant 0 : i32
    %c0_i32_1 = arith.constant 0 : i32
    return %arg0, %c0_i32, %c0_i32_0 : i32, i32, i32
  }
  func.func @transform_11(%arg0: i32) -> (i32, i32, i32) {
    %c0_i32 = arith.constant 0 : i32
    %c0_i32_0 = arith.constant 0 : i32
    %c0_i32_1 = arith.constant 0 : i32
    return %arg0, %c0_i32, %c0_i32_0 : i32, i32, i32
  }
  func.func @transform_12(%arg0: i32) -> (i32, i32) {
    %c0_i32 = arith.constant 0 : i32
    %c0_i32_0 = arith.constant 0 : i32
    %c0_i32_1 = arith.constant 0 : i32
    return %c0_i32, %c0_i32_0 : i32, i32
  }
  func.func @transform_13(%arg0: i32) -> (i32, i32) {
    %c0_i32 = arith.constant 0 : i32
    %c0_i32_0 = arith.constant 0 : i32
    %c0_i32_1 = arith.constant 0 : i32
    return %c0_i32, %c0_i32_0 : i32, i32
  }
  func.func @transform_14(%arg0: i32) -> (i32, i32) {
    %c0_i32 = arith.constant 0 : i32
    %c0_i32_0 = arith.constant 0 : i32
    %c0_i32_1 = arith.constant 0 : i32
    return %c0_i32, %c0_i32_0 : i32, i32
  }
  func.func @transform_15(%arg0: i32) -> (i32, i32) {
    %c0_i32 = arith.constant 0 : i32
    %c0_i32_0 = arith.constant 0 : i32
    %c0_i32_1 = arith.constant 0 : i32
    return %c0_i32, %c0_i32_0 : i32, i32
  }
  func.func @transform_16(%arg0: i32) -> (i32, i32) {
    %c0_i32 = arith.constant 0 : i32
    %c0_i32_0 = arith.constant 0 : i32
    %c0_i32_1 = arith.constant 0 : i32
    return %c0_i32, %c0_i32_0 : i32, i32
  }
  func.func @transform_17(%arg0: i32) -> (i32, i32, i32) {
    %c0_i32 = arith.constant 0 : i32
    %c0_i32_0 = arith.constant 0 : i32
    %c0_i32_1 = arith.constant 0 : i32
    return %arg0, %c0_i32, %c0_i32_0 : i32, i32, i32
  }
}

</mosaic_0001>

<bundles_post_ra>
// kernel: model_forward.2
= control target key start
LH: loop header
LB: loop body
LE: loop exit
PB: predicated region body
PF: predicated region fallthrough
CT: control target
= control target key end

     0   :  { %vm32_vm0 = vcmask 261120   ;;  %v238_v3 = vmov 0.0|0.0   ;;  %vm40_vm1 = vcmask 254976   ;;  %s369_s0 = inlined_call_operand.vmem [shape: f32[4,10,32], index: 0, kind: input, shape index: {}]   ;;  %s370_s1 = inlined_call_operand.vmem [shape: f32[5,2,32], index: 1, kind: input, shape index: {}]   ;;  %s371_s2 = inlined_call_operand.vmem [shape: f32[2,10], index: 2, kind: input, shape index: {}]   ;;  %s372_s3 = inlined_call_operand.vmem [shape: f32[1,32], index: 3, kind: input, shape index: {}]   ;;  %s373_s4 = inlined_call_operand.vmem [shape: f32[1,32], index: 4, kind: input, shape index: {}]   ;;  %s374_s5 = inlined_call_operand.vmem [shape: f32[2,32], index: 5, kind: output, shape index: {0}]   ;;  %s375_s6 = inlined_call_operand.vmem [shape: f32[10,32], index: 6, kind: output, shape index: {1}]   ;;  %s376_s7 = inlined_call_operand.hbm [shape: f32[2,32], index: 7, kind: output, shape index: {2}]  }
   0x1   :  { %v24_v0 = vld [vmem:[%s369_s0] sm:$0xff]  ;;  %v25_v1 = vld [vmem:[%s369_s0 + $0x8] sm:$0x3]  ;;  %v26_v2 = vld [vmem:[%s369_s0 + $0x10] sm:$0xff]  ;;  %201 = vmatprep.subr.bf16.mxu0 %v238_v3 }
   0x2   :  { %v27_v4 = vld [vmem:[%s369_s0 + $0x18] sm:$0x3]  ;;  %v28_v5 = vld [vmem:[%s369_s0 + $0x20] sm:$0xff]  ;;  %v29_v6 = vld [vmem:[%s369_s0 + $0x28] sm:$0x3]  ;;  %v33_v7 = vsel %vm32_vm0, %v24_v0, 0.0 }
   0x3   :  { %v30_v8 = vld [vmem:[%s369_s0 + $0x30] sm:$0xff]  ;;  %v31_v9 = vld [vmem:[%s369_s0 + $0x38] sm:$0x3]  ;;  %v34_v10 = vsel %vm32_vm0, %v26_v2, 0.0  ;;  %v36_v11 = vsel %vm32_vm0, %v28_v5, 0.0  ;;  %v41_v13 = vsel %vm40_vm1, %v25_v1, 0.0 }
   0x4   :  { %v35_v12 = vadd.f32 %v34_v10, %v33_v7  ;;  %v42_v14 = vsel %vm40_vm1, %v27_v4, 0.0  ;;  %v38_v15 = vsel %vm32_vm0, %v30_v8, 0.0  ;;  %v44_v17 = vsel %vm40_vm1, %v29_v6, 0.0 }
   0x5   :  { %v43_v16 = vadd.f32 %v42_v14, %v41_v13  ;;  %v46_v19 = vsel %vm40_vm1, %v31_v9, 0.0 }
   0x6   :  { %v37_v18 = vadd.f32 %v36_v11, %v35_v12 }
   0x7   :  { %13 = vsyncpa [#allocation3], 0  ;;  %v45_v20 = vadd.f32 %v44_v17, %v43_v16  ;;  %v187_v21 = vld [vmem:[%s372_s3] ss:$0 sm:$0xff]  ;;  %vm239_vm2 = vmmov 0   ;;  %v240_v22 = vmov 0.0  }
   0x8   :  { %198 = vmatprep.mubr.msk.f32.mxu0 %vm239_vm2, %v240_v22  ;;  %v39_v23 = vadd.f32 %v38_v15, %v37_v18  ;;  %vm66_vm3 = vcmask 1041408   ;;  %vm241_vm4 = vmmov 1   ;;  %v61_v30 = vld [vmem:[%s371_s2] sm:$0x3]  ;;  %vm62_vm6 = vcmask 80896   ;;  %s242_s10 = smov [#allocation2]  }
   0x9   :  { %v47_v24 = vadd.f32 %v46_v19, %v45_v20  ;;  %vm203_vm5 = vmpackc.low %vm66_vm3, %vm241_vm4  ;;  %v141_v31 = vld [vmem:[%s370_s1] sm:$0x3]  ;;  %v142_v32 = vld [vmem:[%s370_s1 + $0x2] sm:$0x3]  ;;  %s175_s11 = sshll.u32 %s242_s10, 4  ;;  %s176_s11 = int_to_ptr.vmem [resolvable:$true] %s175_s11 }
   0xa   :  { %v55_v25 = vadd.f32 %v187_v21, %v39_v23  ;;  %v146_v33 = vsel %vm40_vm1, %v141_v31, 0.0  ;;  %v147_v34 = vsel %vm40_vm1, %v142_v32, 0.0  ;;  %v143_v35 = vld [vmem:[%s370_s1 + $0x4] sm:$0x3]  ;;  %v144_v38 = vld [vmem:[%s370_s1 + $0x6] sm:$0x3]  ;;  %p219_p1 = scmp.lt.s32.totalorder %s176_s11, %s176_s11 }
   0xb   :  { %v56_v26 = vadd.f32 %v187_v21, %v47_v24  ;;  %v148_v36 = vadd.f32 %v147_v34, %v146_v33  ;;  %v149_v37 = vsel %vm40_vm1, %v143_v35, 0.0  ;;  %v151_v40 = vsel %vm40_vm1, %v144_v38, 0.0  ;;  %v145_v41 = vld [vmem:[%s370_s1 + $0x8] sm:$0x3]  ;;  %v190_v45 = vld [vmem:[%s373_s4] ss:$0 sm:$0xff] }
   0xc   :  { %210 = vtanh.f32 %v55_v25  ;;  %v153_v43 = vsel %vm40_vm1, %v145_v41, 0.0  ;;  %s214_s12 = scalar_lea.vmem %s176_s11, 32 }
   0xd   :  { %212 = vtanh.f32 %v56_v26  ;;  %v150_v39 = vadd.f32 %v149_v37, %v148_v36  ;;  %p215_p0 = scmp.ne.s32.totalorder %s176_s11, %s214_s12  ;;  %p220_p2 = scmp.lt.s32.totalorder %s214_s12, %s214_s12 }
   0xf   :  { %v152_v42 = vadd.f32 %v151_v40, %v150_v39  ;;  %p221_p3 = por %p220_p2, %p219_p1 }
  0x11   :  { %v154_v44 = vadd.f32 %v153_v43, %v152_v42  ;;  %p222_p4 = pnand %p221_p3, %p215_p0 }
  0x13   :  { %v162_v46 = vadd.f32 %v190_v45, %v154_v44 }
  0x15   :  { %v163_v47 = vmax.f32 %v162_v46, 0.0 }
  0x16   :  { %v211_v27 = vpop.eup %210 }
  0x17   :  { %v213_v28 = vpop.eup %212  ;;  %59 = vst.msk [vmem:[%s375_s6] sm:$0xff] %vm32_vm0, %v211_v27 }
  0x18   :  { %60 = vst.msk [vmem:[%s375_s6 + $0x8] sm:$0x3] %vm40_vm1, %v213_v28  ;;  %v202_v29 = vpack.c.bf16 %v213_v28, %v211_v27  ;;  %164 = vst.msk [vmem:[#allocation2] sm:$0x3] %vm40_vm1, %v163_v47 }
  0x1a   :  { %204 = vmatpush3.bf16.msk.msra.mxu0 %vm203_vm5, %v202_v29 }
  0x1d   :  { %199 = vmatmul.mubr.msk.f32.vlgmr.msra.gmra.mrb[0].mxu0 %vm62_vm6, %v61_v30 }
  0x1e   :  { %225 = shalt.err (!%p222_p4)
}
  0x1f   :  { %s226_s14 = scalar_lea.hbm %s376_s7, 32 }
  0x20   :  { %p227_p5 = scmp.ne.s32.totalorder %s376_s7, %s226_s14  ;;  %p230_p6 = scmp.lt.u32.totalorder %s226_s14, %s376_s7 }
  0x22   :  { %p232_p7 = pnand %p230_p6, %p227_p5 }
  0x24   :  { %235 = shalt.err (!%p232_p7)
}
  0x25   :  { %178 = dma.vmem_to_hbm [thread:$0]  %s176_s11, 32, %s376_s7, [#allocation3]  }
  0xf0   :  { %v136_v48 = vpop.f32.mrb[0].mxu0 }
  0xf1   :  { %140 = vst.msk [vmem:[%s374_s5] sm:$0x3] %vm40_vm1, %v136_v48  ;;  %v200_v49 = vpop.f32.mrb[1].mxu0 }
  0xf2   :  { %236 = dma.done.wait [#allocation3], 32  }
  0xf3   :  { %237 = vsyncadd [#allocation3], 4294967264 }
  0xf4   :  { %186 = vsyncpa [#allocation3], 1 }

// kernel: model_forward.3
= control target key start
LH: loop header
LB: loop body
LE: loop exit
PB: predicated region body
PF: predicated region fallthrough
CT: control target
= control target key end

     0   :  { %s3711_s24 = smov 0   ;;  %s4580_s0 = inlined_call_operand.vmem [shape: f32[80,64], index: 0, kind: input, shape index: {}]   ;;  %s4581_s1 = inlined_call_operand.vmem [shape: f32[16,32], index: 1, kind: input, shape index: {}]   ;;  %s4582_s2 = inlined_call_operand.vmem [shape: f32[16,32], index: 2, kind: input, shape index: {}]   ;;  %s4583_s3 = inlined_call_operand.vmem [shape: f32[3,64,128], index: 3, kind: input, shape index: {}]   ;;  %s4584_s4 = inlined_call_operand.vmem [shape: f32[3,32,128], index: 4, kind: input, shape index: {}]   ;;  %s4585_s5 = inlined_call_operand.vmem [shape: f32[3,1,128], index: 5, kind: input, shape index: {}]   ;;  %s4586_s6 = inlined_call_operand.vmem [shape: f32[3,1,32], index: 6, kind: input, shape index: {}]   ;;  %s4587_s7 = inlined_call_operand.vmem [shape: f32[3,1,32], index: 7, kind: input, shape index: {}]   ;;  %s4588_s8 = inlined_call_operand.vmem [shape: f32[3,1,32], index: 8, kind: input, shape index: {}]   ;;  %s4589_s9 = inlined_call_operand.vmem [shape: f32[3,1,32], index: 9, kind: input, shape index: {}]   ;;  %s4590_s10 = inlined_call_operand.vmem [shape: f32[3,1,64], index: 10, kind: input, shape index: {}]   ;;  %s4591_s11 = inlined_call_operand.vmem [shape: f32[3,1,64], index: 11, kind: input, shape index: {}]   ;;  %s4592_s12 = inlined_call_operand.vmem [shape: f32[10,32], index: 12, kind: input, shape index: {}]   ;;  %s4593_s13 = inlined_call_operand.vmem [shape: f32[32,10], index: 13, kind: input, shape index: {}]   ;;  %s4594_s14 = inlined_call_operand.vmem [shape: f32[80,10], index: 14, kind: input, shape index: {}]   ;;  %s4595_s15 = inlined_call_operand.vmem [shape: f32[64,51], index: 15, kind: input, shape index: {}]   ;;  %s4596_s16 = inlined_call_operand.vmem [shape: f32[1,51], index: 16, kind: input, shape index: {}]   ;;  %s4597_s17 = inlined_call_operand.vmem [shape: f32[3,80,128], index: 17, kind: output, shape index: {}]  }
   0x1   :  { %4600 = sst [smem:[#allocation2_spill]] %s4580_s0 }
   0x2   :  { %4601 = sst [smem:[#allocation3_spill]] %s4581_s1 }
   0x3 LB: > { %s2873_s25 = sadd.s32 4294967295, %s3613_s24   ;;  %p2877_p0 = scmp.ge.s32.totalorder %s3613_s24, 1  ;;  %s3613_s24 = sphi %s3711_s24, %s27_s24  }
   0x4   : > { %p553_p1 = scmp.lt.s32.totalorder %s3613_s24, 4 }
   0x6   : > { %p554_p2 = pnand %p2877_p0, %p553_p1 }
   0x7   : > { %p631_p3 = scmp.lt.s32.totalorder (!%p554_p2), %s2873_s25, 2  ;;  %s4602_s28 = sld [smem:[#allocation2_spill]] (!%p554_p2)  ;;  %vm692_vm0 = vcmask (!%p554_p2), 523264   ;;  %v844_v1 = vld [vmem:[%s4582_s2] sm:$0xff] (!%p554_p2)  ;;  %v845_v2 = vld [vmem:[%s4582_s2 + $0x8] sm:$0xff] (!%p554_p2)  ;;  %vm846_vm1 = vcmask (!%p554_p2), 261120  }
   0x8   : > { %557 = sbr.rel (%p554_p2) target bundleno = 5180 (0x143c), region = 88  ;;  %s3615_s20 = smov (!%p554_p2), 32   ;;  %vm1921_vm2 = vcmask (!%p554_p2), 80896   ;;  %vm2064_vm3 = vcmask (!%p554_p2), 1041408   ;;  %vm3618_vm4 = vmmov (!%p554_p2), 1   ;;  %vm2601_vm6 = vcmask (!%p554_p2), 416768  }
   0x9   : > { %946 = vrot.lane.b32.xlu1 (!%p554_p2), %v844_v1, %s3615_s20  ;;  %s4603_s27 = sld [smem:[#allocation3_spill]] (!%p554_p2)  ;;  %s3617_s30 = smov (!%p554_p2), 96   ;;  %vm3307_vm5 = vmpackc.low (!%p554_p2), %vm2064_vm3, %vm3618_vm4  ;;  %vm2612_vm7 = vcmask (!%p554_p2), 457728  }
   0xd   : > { %v667_v0 = vld [vmem:[%s4602_s28] sm:$0xff] (!%p554_p2)  ;;  %948 = vrot.lane.b32.xlu1 (!%p554_p2), %v845_v2, %s3615_s20  ;;  %v668_v20 = vld [vmem:[%s4602_s28 + $0x8] sm:$0xff] (!%p554_p2)  ;;  %v669_v21 = vld [vmem:[%s4602_s28 + $0x10] sm:$0xff] (!%p554_p2) }
   0xe   : > { %3084 = vmatprep.mubr.msk.f32.mxu0 (!%p554_p2), %vm692_vm0, %v667_v0  ;;  %v670_v23 = vld [vmem:[%s4602_s28 + $0x18] sm:$0xff] (!%p554_p2)  ;;  %v671_v24 = vld [vmem:[%s4602_s28 + $0x20] sm:$0xff] (!%p554_p2)  ;;  %v672_v25 = vld [vmem:[%s4602_s28 + $0x28] sm:$0xff] (!%p554_p2) }
   0xf   : > { %s4605_s25 = smov (!%p631_p3, %s2873_s25), 2  ;;  %v673_v26 = vld [vmem:[%s4602_s28 + $0x30] sm:$0xff]  ;;  %v674_v27 = vld [vmem:[%s4602_s28 + $0x38] sm:$0xff]  ;;  %v675_v28 = vld [vmem:[%s4602_s28 + $0x40] sm:$0xff] }
  0x10   : > { %s2964_s29 = sshll.u32 %s4605_s25, 6  ;;  %s2965_s23 = sshll.u32 %s4605_s25, 5  ;;  %v676_v29 = vld [vmem:[%s4602_s28 + $0x48] sm:$0xff]  ;;  %v842_v30 = vld [vmem:[%s4603_s27] sm:$0xff] }
  0x11   : > { %s635_s1 = scalar_lea.vmem %s4583_s3, %s2964_s29  ;;  %s640_s29 = scalar_lea.vmem %s4584_s4, %s2965_s23  ;;  %v843_v31 = vld [vmem:[%s4603_s27 + $0x8] sm:$0xff] }
  0x12   : > { %v677_v3 = vld [vmem:[%s635_s1] sm:$0xff]  ;;  %v678_v4 = vld [vmem:[%s635_s1 + $0x8] sm:$0xff]  ;;  %v679_v5 = vld [vmem:[%s635_s1 + $0x10] sm:$0xff]  ;;  %s643_s19 = scalar_lea.vmem %s4585_s5, %s4605_s25  ;;  %s649_s23 = scalar_lea.vmem %s4587_s7, %s4605_s25 }
  0x13   : > { %v3242_v6 = vpack.c.bf16 %v678_v4, %v677_v3  ;;  %v680_v7 = vld [vmem:[%s635_s1 + $0x18] sm:$0xff]  ;;  %v681_v9 = vld [vmem:[%s635_s1 + $0x20] sm:$0xff]  ;;  %v682_v10 = vld [vmem:[%s635_s1 + $0x28] sm:$0xff]  ;;  %s646_s0 = scalar_lea.vmem %s4586_s6, %s4605_s25  ;;  %s655_s21 = scalar_lea.vmem %s4589_s9, %s4605_s25 }
  0x14   : > { %v3246_v8 = vpack.c.bf16 %v680_v7, %v679_v5  ;;  %v3250_v11 = vpack.c.bf16 %v682_v10, %v681_v9  ;;  %v683_v12 = vld [vmem:[%s635_s1 + $0x30] sm:$0xff]  ;;  %v684_v13 = vld [vmem:[%s635_s1 + $0x38] sm:$0xff]  ;;  %v838_v15 = vld [vmem:[%s640_s29] sm:$0xff]  ;;  %s3616_s1 = smov 64   ;;  %s658_s18 = scalar_lea.vmem %s4590_s10, %s4605_s25 }
  0x15   : > { %3243 = vmatprep.subr.bf16.mxu0 %v3242_v6  ;;  %v3254_v14 = vpack.c.bf16 %v684_v13, %v683_v12  ;;  %v839_v16 = vld [vmem:[%s640_s29 + $0x8] sm:$0xff]  ;;  %v840_v18 = vld [vmem:[%s640_s29 + $0x10] sm:$0xff]  ;;  %v841_v19 = vld [vmem:[%s640_s29 + $0x18] sm:$0xff] }
  0x16   : > { %3245 = vmatpush3.bf16.msra.mxu0 %v3242_v6  ;;  %v3741_v17 = vpack.c.bf16 %v839_v16, %v838_v15  ;;  %v3750_v22 = vpack.c.bf16 %v841_v19, %v840_v18  ;;  %v3802_v32 = vld [vmem:[%s643_s19] ss:$0 sm:$0xff] }
  0x17   : > { %3247 = vmatprep.subr.bf16.mxu0 %v3246_v8 }
  0x1a   : > { %3249 = vmatpush3.bf16.msra.mxu0 %v3246_v8 }
  0x1b   : > { %3251 = vmatprep.subr.bf16.mxu0 %v3250_v11 }
  0x1e   : > { %3253 = vmatpush3.bf16.msra.mxu0 %v3250_v11 }
  0x1f   : > { %3255 = vmatprep.subr.bf16.mxu0 %v3254_v14 }
  0x22   : > { %3257 = vmatpush3.bf16.msra.mxu0 %v3254_v14 }
  0x23   : > { %3259 = vmatprep.subr.bf16.mxu0 %v3741_v17 }
  0x25   : > { %3085 = vmatmul.mubr.msk.f32.vlgmr.msra.gmra.mrb[0].mxu0 %vm692_vm0, %v668_v20 }
  0x26   : > { %3261 = vmatpush3.bf16.msra.mxu0 %v3741_v17  ;;  %3087 = vmatprep.mubr.msk.f32.mxu0 %vm692_vm0, %v669_v21 }
  0x27   : > { %3263 = vmatprep.subr.bf16.mxu0 %v3750_v22 }
  0x29   : > { %3088 = vmatmul.mubr.msk.f32.gmra.mrb[2].mxu0 %vm692_vm0, %v670_v23 }
  0x2a   : > { %3090 = vmatprep.mubr.msk.f32.mxu0 %vm692_vm0, %v671_v24  ;;  %3265 = vmatpush3.bf16.msra.mxu0 %v3750_v22 }
  0x2b   : > { %3267 = vmatprep.subr.bf16.mxu0 %v3741_v17 }
  0x2d   : > { %3091 = vmatmul.mubr.msk.f32.gmra.mrb[4].mxu0 %vm692_vm0, %v672_v25 }
  0x2e   : > { %3093 = vmatprep.mubr.msk.f32.mxu0 %vm692_vm0, %v673_v26 }
  0x31   : > { %3094 = vmatmul.mubr.msk.f32.gmra.mrb[6].mxu0 %vm692_vm0, %v674_v27 }
  0x32   : > { %3096 = vmatprep.mubr.msk.f32.mxu0 %vm692_vm0, %v675_v28 }
  0x35   : > { %3097 = vmatmul.mubr.msk.f32.gmra.mrb[8].mxu0 %vm692_vm0, %v676_v29 }
  0x36   : > { %3107 = vmatprep.mubr.msk.f32.mxu0 %vm846_vm1, %v842_v30 }
  0x39   : > { %3108 = vmatmul.mubr.msk.f32.vlgmr.msra.gmra.mrb[0].mxu0 %vm846_vm1, %v843_v31 }
  0x3a   : > { %3269 = vmatpush3.bf16.msra.mxu0 %v3741_v17 }
  0x3b   : > { %3271 = vmatprep.subr.bf16.mxu0 %v3750_v22 }
  0x3e   : > { %3273 = vmatpush3.bf16.msra.mxu0 %v3750_v22 }
  0x3f   : > { %3275 = vmatprep.subr.bf16.mxu0 %v3741_v17 }
  0x7b   : > { %v947_v51 = vpop.permute.xlu1 %946 }
  0x7f   : > { %v949_v53 = vpop.permute.xlu1 %948 }
 0x10c   : > { %v3109_v33 = vpop.f32.mrb[0].mxu0 }
 0x10d   : > { %v919_v34 = vpop.f32.mrb[1].mxu0  ;;  %v3332_v36 = vadd.f32 %v3109_v33, %v3802_v32 }
 0x10e   : > { %v3333_v35 = vadd.f32 %v3802_v32, %v919_v34 }
 0x10f   : > { %v2897_v40 = vmul.f32 -1.442695, %v3332_v36 }
 0x110   : > { %3367 = vtanh.f32 %v3333_v35  ;;  %v2896_v39 = vmul.f32 -1.442695, %v3333_v35 }
 0x111   : > { %3369 = vtanh.f32 %v3332_v36 }
 0x112   : > { %3371 = vpow2.f32 %v2896_v39 }
 0x113   : > { %3373 = vpow2.f32 %v2897_v40 }
 0x11a   : > { %v3368_v37 = vpop.eup %3367 }
 0x11b   : > { %956 = vrot.lane.b32.xlu0 %v3368_v37, %s3616_s1  ;;  %v3370_v38 = vpop.eup %3369 }
 0x11c   : > { %v3372_v41 = vpop.eup %3371 }
 0x11d   : > { %v936_v42 = vadd.f32 1.0, %v3372_v41  ;;  %v3374_v43 = vpop.eup %3373 }
 0x11e   : > { %v937_v44 = vadd.f32 1.0, %v3374_v43 }
 0x11f   : > { %958 = vrot.lane.b32.xlu0 %v3370_v38, %s3616_s1  ;;  %3375 = vrcp.f32 %v936_v42 }
 0x120   : > { %3377 = vrcp.f32 %v937_v44 }
 0x129   : > { %v3376_v45 = vpop.eup %3375 }
 0x12a   : > { %v3378_v48 = vpop.eup %3377  ;;  %v952_v52 = vmul.f32 %v3376_v45, %v947_v51 }
 0x12b   : > { %v953_v56 = vmul.f32 %v3378_v48, %v949_v53 }
 0x18d   : > { %v957_v46 = vpop.permute.xlu0 %956 }
 0x18e   : > { %v962_v47 = vmul.f32 %v3376_v45, %v957_v46 }
 0x190   : > { %966 = vrot.lane.b32.xlu0 %v962_v47, %s3615_s20 }
 0x191   : > { %v959_v49 = vpop.permute.xlu0 %958 }
 0x192   : > { %v963_v50 = vmul.f32 %v3378_v48, %v959_v49 }
 0x194   : > { %968 = vrot.lane.b32.xlu1 %v963_v50, %s3615_s20 }
 0x202   : > { %v967_v54 = vpop.permute.xlu0 %966 }
 0x203   : > { %v972_v55 = vadd.f32 %v967_v54, %v952_v52 }
 0x205   : > { %3379 = vtanh.f32 %v972_v55 }
 0x206   : > { %v969_v57 = vpop.permute.xlu1 %968 }
 0x207   : > { %v973_v58 = vadd.f32 %v969_v57, %v953_v56 }
 0x209   : > { %3381 = vtanh.f32 %v973_v58 }
 0x20f   : > { %v3380_v59 = vpop.eup %3379 }
 0x210   : > { %978 = vrot.lane.b32.xlu0 %v3380_v59, %s3616_s1 }
 0x213   : > { %v3382_v60 = vpop.eup %3381 }
 0x214   : > { %980 = vrot.lane.b32.xlu1 %v3382_v60, %s3616_s1 }
 0x282   : > { %v979_v61 = vpop.permute.xlu0 %978 }
 0x283   : > { %v3812_v62 = vmul.f32 %v3376_v45, %v979_v61 }
 0x285   : > { %988 = vrot.lane.b32.xlu0 %v3812_v62, %s3615_s20 }
 0x286   : > { %v981_v63 = vpop.permute.xlu1 %980 }
 0x287   : > { %v3816_v0 = vmul.f32 %v3378_v48, %v981_v63 }
 0x289   : > { %990 = vrot.lane.b32.xlu1 %v3816_v0, %s3615_s20 }
 0x2f7   : > { %v989_v1 = vpop.permute.xlu0 %988 }
 0x2f8   : > { %3118 = vmatprep.mubr.msk.f32.mxu0 %vm846_vm1, %v989_v1 }
 0x2fb   : > { %v991_v2 = vpop.permute.xlu1 %990 }
 0x2fc   : > { %3119 = vmatmul.mubr.msk.f32.vlgmr.msra.gmra.mrb[2].mxu0 %vm846_vm1, %v991_v2 }
 0x2fd   : > { %3277 = vmatpush3.bf16.msra.mxu0 %v3741_v17 }
 0x2fe   : > { %3279 = vmatprep.subr.bf16.mxu0 %v3750_v22 }
 0x301   : > { %3281 = vmatpush3.bf16.msra.mxu0 %v3750_v22 }
 0x302   : > { %3283 = vmatprep.subr.bf16.mxu0 %v3741_v17 }
 0x3cf   : > { %v3120_v3 = vpop.f32.mrb[2].mxu0 }
 0x3d0   : > { %v3334_v4 = vadd.f32 %v3120_v3, %v3802_v32  ;;  %v1062_v5 = vpop.f32.mrb[3].mxu0 }
 0x3d1   : > { %v3335_v6 = vadd.f32 %v3802_v32, %v1062_v5 }
 0x3d2   : > { %3383 = vtanh.f32 %v3334_v4  ;;  %v2901_v9 = vmul.f32 -1.442695, %v3334_v4 }
 0x3d3   : > { %3385 = vtanh.f32 %v3335_v6  ;;  %v2900_v10 = vmul.f32 -1.442695, %v3335_v6 }
 0x3d4   : > { %3387 = vpow2.f32 %v2901_v9 }
 0x3d5   : > { %3389 = vpow2.f32 %v2900_v10 }
 0x3dc   : > { %v3384_v7 = vpop.eup %3383 }
 0x3dd   : > { %v3386_v8 = vpop.eup %3385  ;;  %1093 = vrot.lane.b32.xlu1 %v3384_v7, %s3616_s1 }
 0x3de   : > { %1091 = vrot.lane.b32.xlu0 %v3386_v8, %s3616_s1  ;;  %v3388_v11 = vpop.eup %3387 }
 0x3df   : > { %v3390_v12 = vpop.eup %3389  ;;  %v1080_v13 = vadd.f32 1.0, %v3388_v11 }
 0x3e0   : > { %v1079_v14 = vadd.f32 1.0, %v3390_v12 }
 0x3e1   : > { %3391 = vrcp.f32 %v1080_v13 }
 0x3e2   : > { %3393 = vrcp.f32 %v1079_v14 }
 0x3eb   : > { %v3392_v15 = vpop.eup %3391 }
 0x3ec   : > { %v3394_v18 = vpop.eup %3393  ;;  %v1088_v23 = vmul.f32 %v3392_v15, %v973_v58 }
 0x3ed   : > { %v1087_v25 = vmul.f32 %v3394_v18, %v972_v55 }
 0x44f   : > { %v1094_v16 = vpop.permute.xlu1 %1093 }
 0x450   : > { %v1098_v19 = vmul.f32 %v3392_v15, %v1094_v16  ;;  %v1092_v20 = vpop.permute.xlu0 %1091 }
 0x451   : > { %v1097_v21 = vmul.f32 %v3394_v18, %v1092_v20 }
 0x452   : > { %1103 = vrot.lane.b32.xlu1 %v1098_v19, %s3615_s20 }
 0x453   : > { %1101 = vrot.lane.b32.xlu0 %v1097_v21, %s3615_s20 }
 0x4c4   : > { %v1104_v24 = vpop.permute.xlu1 %1103 }
 0x4c5   : > { %v1108_v26 = vadd.f32 %v1104_v24, %v1088_v23  ;;  %v1102_v27 = vpop.permute.xlu0 %1101 }
 0x4c6   : > { %v1107_v28 = vadd.f32 %v1102_v27, %v1087_v25 }
 0x4c7   : > { %3395 = vtanh.f32 %v1108_v26 }
 0x4c8   : > { %3397 = vtanh.f32 %v1107_v28 }
 0x4d1   : > { %v3396_v29 = vpop.eup %3395 }
 0x4d2   : > { %v3398_v30 = vpop.eup %3397  ;;  %1115 = vrot.lane.b32.xlu1 %v3396_v29, %s3616_s1 }
 0x4d3   : > { %1113 = vrot.lane.b32.xlu0 %v3398_v30, %s3616_s1 }
 0x544   : > { %v1116_v31 = vpop.permute.xlu1 %1115 }
 0x545   : > { %v3834_v33 = vmul.f32 %v3392_v15, %v1116_v31  ;;  %v1114_v34 = vpop.permute.xlu0 %1113 }
 0x546   : > { %v3836_v35 = vmul.f32 %v3394_v18, %v1114_v34 }
 0x547   : > { %1125 = vrot.lane.b32.xlu1 %v3834_v33, %s3615_s20 }
 0x548   : > { %1123 = vrot.lane.b32.xlu0 %v3836_v35, %s3615_s20 }
 0x5b9   : > { %v1126_v37 = vpop.permute.xlu1 %1125 }
 0x5ba   : > { %v1124_v36 = vpop.permute.xlu0 %1123 }
 0x5bb   : > { %3129 = vmatprep.mubr.msk.f32.mxu0 %vm846_vm1, %v1124_v36 }
 0x5bc   : > { %3130 = vmatmul.mubr.msk.f32.vlgmr.msra.gmra.mrb[4].mxu0 %vm846_vm1, %v1126_v37 }
 0x5bd   : > { %3285 = vmatpush3.bf16.msra.mxu0 %v3741_v17 }
 0x5be   : > { %3287 = vmatprep.subr.bf16.mxu0 %v3750_v22 }
 0x5c1   : > { %3289 = vmatpush3.bf16.msra.mxu0 %v3750_v22 }
 0x5c2   : > { %3291 = vmatprep.subr.bf16.mxu0 %v3741_v17 }
 0x68f   : > { %v3131_v38 = vpop.f32.mrb[4].mxu0 }
 0x690   : > { %v3336_v39 = vadd.f32 %v3131_v38, %v3802_v32  ;;  %v1197_v40 = vpop.f32.mrb[5].mxu0 }
 0x691   : > { %v3337_v41 = vadd.f32 %v3802_v32, %v1197_v40 }
 0x692   : > { %3399 = vtanh.f32 %v3336_v39  ;;  %v2905_v44 = vmul.f32 -1.442695, %v3336_v39 }
 0x693   : > { %3401 = vtanh.f32 %v3337_v41  ;;  %v2904_v45 = vmul.f32 -1.442695, %v3337_v41 }
 0x694   : > { %3403 = vpow2.f32 %v2905_v44 }
 0x695   : > { %3405 = vpow2.f32 %v2904_v45 }
 0x69c   : > { %v3400_v42 = vpop.eup %3399 }
 0x69d   : > { %v3402_v43 = vpop.eup %3401  ;;  %1228 = vrot.lane.b32.xlu1 %v3400_v42, %s3616_s1 }
 0x69e   : > { %1226 = vrot.lane.b32.xlu0 %v3402_v43, %s3616_s1  ;;  %v3404_v46 = vpop.eup %3403 }
 0x69f   : > { %v3406_v47 = vpop.eup %3405  ;;  %v1215_v48 = vadd.f32 1.0, %v3404_v46 }
 0x6a0   : > { %v1214_v49 = vadd.f32 1.0, %v3406_v47 }
 0x6a1   : > { %3407 = vrcp.f32 %v1215_v48 }
 0x6a2   : > { %3409 = vrcp.f32 %v1214_v49 }
 0x6ab   : > { %v3408_v50 = vpop.eup %3407 }
 0x6ac   : > { %v3410_v52 = vpop.eup %3409  ;;  %v1223_v56 = vmul.f32 %v3408_v50, %v1108_v26 }
 0x6ad   : > { %v1222_v58 = vmul.f32 %v3410_v52, %v1107_v28 }
 0x70f   : > { %v1229_v51 = vpop.permute.xlu1 %1228 }
 0x710   : > { %v1233_v53 = vmul.f32 %v3408_v50, %v1229_v51  ;;  %v1227_v54 = vpop.permute.xlu0 %1226 }
 0x711   : > { %v1232_v55 = vmul.f32 %v3410_v52, %v1227_v54 }
 0x712   : > { %1238 = vrot.lane.b32.xlu1 %v1233_v53, %s3615_s20 }
 0x713   : > { %1236 = vrot.lane.b32.xlu0 %v1232_v55, %s3615_s20 }
 0x784   : > { %v1239_v57 = vpop.permute.xlu1 %1238 }
 0x785   : > { %v1243_v59 = vadd.f32 %v1239_v57, %v1223_v56  ;;  %v1237_v60 = vpop.permute.xlu0 %1236 }
 0x786   : > { %v1242_v61 = vadd.f32 %v1237_v60, %v1222_v58  ;;  %v2915_v60 = vld [vmem:[%s649_s23] ss:$0 sm:$0xff] }
 0x787   : > { %3411 = vtanh.f32 %v1243_v59 }
 0x788   : > { %3413 = vtanh.f32 %v1242_v61 }
 0x791   : > { %v3412_v63 = vpop.eup %3411 }
 0x792   : > { %v3414_v1 = vpop.eup %3413  ;;  %1250 = vrot.lane.b32.xlu1 %v3412_v63, %s3616_s1 }
 0x793   : > { %1248 = vrot.lane.b32.xlu0 %v3414_v1, %s3616_s1 }
 0x804   : > { %v1251_v2 = vpop.permute.xlu1 %1250 }
 0x805   : > { %v3856_v3 = vmul.f32 %v3408_v50, %v1251_v2  ;;  %v1249_v4 = vpop.permute.xlu0 %1248 }
 0x806   : > { %v3858_v5 = vmul.f32 %v3410_v52, %v1249_v4 }
 0x807   : > { %1260 = vrot.lane.b32.xlu1 %v3856_v3, %s3615_s20 }
 0x808   : > { %1258 = vrot.lane.b32.xlu0 %v3858_v5, %s3615_s20 }
 0x879   : > { %v1261_v7 = vpop.permute.xlu1 %1260 }
 0x87a   : > { %v1259_v6 = vpop.permute.xlu0 %1258 }
 0x87b   : > { %3140 = vmatprep.mubr.msk.f32.mxu0 %vm846_vm1, %v1259_v6 }
 0x87c   : > { %3141 = vmatmul.mubr.msk.f32.vlgmr.msra.gmra.mrb[6].mxu0 %vm846_vm1, %v1261_v7 }
 0x87d   : > { %3293 = vmatpush3.bf16.msra.mxu0 %v3741_v17 }
 0x87e   : > { %3295 = vmatprep.subr.bf16.mxu0 %v3750_v22 }
 0x881   : > { %3297 = vmatpush3.bf16.msra.mxu0 %v3750_v22 }
 0x94f   : > { %v3142_v8 = vpop.f32.mrb[6].mxu0 }
 0x950   : > { %v3338_v9 = vadd.f32 %v3142_v8, %v3802_v32  ;;  %v1332_v10 = vpop.f32.mrb[7].mxu0 }
 0x951   : > { %v3339_v11 = vadd.f32 %v3802_v32, %v1332_v10 }
 0x952   : > { %3415 = vtanh.f32 %v3338_v9  ;;  %v2909_v14 = vmul.f32 -1.442695, %v3338_v9 }
 0x953   : > { %3417 = vtanh.f32 %v3339_v11  ;;  %v2908_v17 = vmul.f32 -1.442695, %v3339_v11 }
 0x954   : > { %3419 = vpow2.f32 %v2909_v14  ;;  %v1622_v14 = vld [vmem:[%s4593_s13] sm:$0xff] }
 0x955   : > { %3421 = vpow2.f32 %v2908_v17  ;;  %v1623_v17 = vld [vmem:[%s4593_s13 + $0x8] sm:$0xff] }
 0x95c   : > { %v3416_v12 = vpop.eup %3415 }
 0x95d   : > { %v3418_v13 = vpop.eup %3417  ;;  %1363 = vrot.lane.b32.xlu1 %v3416_v12, %s3616_s1 }
 0x95e   : > { %1361 = vrot.lane.b32.xlu0 %v3418_v13, %s3616_s1  ;;  %v3420_v15 = vpop.eup %3419 }
 0x95f   : > { %v3422_v22 = vpop.eup %3421  ;;  %v1350_v16 = vadd.f32 1.0, %v3420_v15 }
 0x960   : > { %v1349_v18 = vadd.f32 1.0, %v3422_v22 }
 0x961   : > { %3423 = vrcp.f32 %v1350_v16  ;;  %v1624_v16 = vld [vmem:[%s4593_s13 + $0x10] sm:$0xff] }
 0x962   : > { %3425 = vrcp.f32 %v1349_v18  ;;  %v1625_v18 = vld [vmem:[%s4593_s13 + $0x18] sm:$0xff] }
 0x96b   : > { %v3424_v19 = vpop.eup %3423 }
 0x96c   : > { %v3426_v21 = vpop.eup %3425  ;;  %v1358_v26 = vmul.f32 %v3424_v19, %v1243_v59 }
 0x96d   : > { %v1357_v28 = vmul.f32 %v3426_v21, %v1242_v61  ;;  %v2914_v61 = vld [vmem:[%s646_s0] ss:$0 sm:$0xff]  ;;  %s661_s0 = scalar_lea.vmem %s4591_s11, %s4605_s25 }
 0x9cf   : > { %v1364_v20 = vpop.permute.xlu1 %1363 }
 0x9d0   : > { %v1368_v23 = vmul.f32 %v3424_v19, %v1364_v20  ;;  %v1362_v24 = vpop.permute.xlu0 %1361 }
 0x9d1   : > { %v1367_v25 = vmul.f32 %v3426_v21, %v1362_v24 }
 0x9d2   : > { %1373 = vrot.lane.b32.xlu1 %v1368_v23, %s3615_s20  ;;  %v3302_v23 = vpack.c.bf16 %v1625_v18, %v1624_v16  ;;  %v4013_v18 = vld [vmem:[%s4594_s14 + $0x20] sm:$0xff] }
 0x9d3   : > { %1371 = vrot.lane.b32.xlu0 %v1367_v25, %s3615_s20 }
 0xa44   : > { %v1374_v27 = vpop.permute.xlu1 %1373 }
 0xa45   : > { %v1378_v29 = vadd.f32 %v1374_v27, %v1358_v26  ;;  %v1372_v30 = vpop.permute.xlu0 %1371 }
 0xa46   : > { %v1377_v31 = vadd.f32 %v1372_v30, %v1357_v28 }
 0xa47   : > { %3427 = vtanh.f32 %v1378_v29 }
 0xa48   : > { %3429 = vtanh.f32 %v1377_v31 }
 0xa51   : > { %v3428_v34 = vpop.eup %3427 }
 0xa52   : > { %v3430_v36 = vpop.eup %3429  ;;  %1385 = vrot.lane.b32.xlu1 %v3428_v34, %s3616_s1 }
 0xa53   : > { %1383 = vrot.lane.b32.xlu0 %v3430_v36, %s3616_s1 }
 0xac4   : > { %v1386_v37 = vpop.permute.xlu1 %1385 }
 0xac5   : > { %v3877_v38 = vmul.f32 %v3424_v19, %v1386_v37  ;;  %v1384_v39 = vpop.permute.xlu0 %1383 }
 0xac6   : > { %v3879_v40 = vmul.f32 %v3426_v21, %v1384_v39  ;;  %v3298_v21 = vpack.c.bf16 %v1623_v17, %v1622_v14 }
 0xac7   : > { %1395 = vrot.lane.b32.xlu1 %v3877_v38, %s3615_s20 }
 0xac8   : > { %1393 = vrot.lane.b32.xlu0 %v3879_v40, %s3615_s20  ;;  %3299 = vmatprep.subr.bf16.mxu0 %v3298_v21 }
 0xac9   : > { %3328 = vmatprep.subr.bf16.mxu1 %v3298_v21 }
 0xaca   : > { %3330 = vmatpush3.bf16.msra.mxu1 %v3298_v21 }
 0xacb   : > { %3329 = vmatprep.subr.bf16.mxu1 %v3302_v23 }
 0xace   : > { %3331 = vmatpush3.bf16.msra.mxu1 %v3302_v23 }
 0xb39   : > { %v1396_v42 = vpop.permute.xlu1 %1395 }
 0xb3a   : > { %v1394_v41 = vpop.permute.xlu0 %1393 }
 0xb3b   : > { %3151 = vmatprep.mubr.msk.f32.mxu0 %vm846_vm1, %v1394_v41 }
 0xb3c   : > { %3152 = vmatmul.mubr.msk.f32.vlgmr.msra.gmra.mrb[8].mxu0 %vm846_vm1, %v1396_v42 }
 0xb3d   : > { %3301 = vmatpush3.bf16.msra.mxu0 %v3298_v21 }
 0xb3e   : > { %3303 = vmatprep.subr.bf16.mxu0 %v3302_v23 }
 0xb41   : > { %3305 = vmatpush3.bf16.msra.mxu0 %v3302_v23  ;;  %v4020_v23 = vld [vmem:[%s4594_s14 + $0x28] sm:$0xff] }
 0xc0f   : > { %v3153_v43 = vpop.f32.mrb[8].mxu0 }
 0xc10   : > { %v3340_v44 = vadd.f32 %v3153_v43, %v3802_v32  ;;  %v1467_v45 = vpop.f32.mrb[9].mxu0 }
 0xc11   : > { %v3341_v46 = vadd.f32 %v3802_v32, %v1467_v45 }
 0xc12   : > { %3431 = vtanh.f32 %v3340_v44  ;;  %v2913_v49 = vmul.f32 -1.442695, %v3340_v44 }
 0xc13   : > { %3433 = vtanh.f32 %v3341_v46  ;;  %v2912_v50 = vmul.f32 -1.442695, %v3341_v46 }
 0xc14   : > { %3435 = vpow2.f32 %v2913_v49 }
 0xc15   : > { %3437 = vpow2.f32 %v2912_v50 }
 0xc1c   : > { %v3432_v47 = vpop.eup %3431 }
 0xc1d   : > { %v3434_v48 = vpop.eup %3433  ;;  %1498 = vrot.lane.b32.xlu1 %v3432_v47, %s3616_s1 }
 0xc1e   : > { %1496 = vrot.lane.b32.xlu0 %v3434_v48, %s3616_s1  ;;  %v3436_v51 = vpop.eup %3435 }
 0xc1f   : > { %v3438_v52 = vpop.eup %3437  ;;  %v1485_v53 = vadd.f32 1.0, %v3436_v51 }
 0xc20   : > { %v1484_v54 = vadd.f32 1.0, %v3438_v52 }
 0xc21   : > { %3439 = vrcp.f32 %v1485_v53 }
 0xc22   : > { %3441 = vrcp.f32 %v1484_v54 }
 0xc2b   : > { %v3891_v32 = vpop.eup %3439 }
 0xc2c   : > { %v3893_v56 = vpop.eup %3441  ;;  %v1493_v63 = vmul.f32 %v3891_v32, %v1378_v29 }
 0xc2d   : > { %v1492_v2 = vmul.f32 %v3893_v56, %v1377_v31 }
 0xc8f   : > { %v1499_v55 = vpop.permute.xlu1 %1498 }
 0xc90   : > { %v1503_v57 = vmul.f32 %v3891_v32, %v1499_v55  ;;  %v1497_v58 = vpop.permute.xlu0 %1496 }
 0xc91   : > { %v1502_v59 = vmul.f32 %v3893_v56, %v1497_v58 }
 0xc92   : > { %1508 = vrot.lane.b32.xlu1 %v1503_v57, %s3615_s20 }
 0xc93   : > { %1506 = vrot.lane.b32.xlu0 %v1502_v59, %s3615_s20 }
 0xc96   : > { %1551 = vrot.lane.b32.xlu1 %v2915_v60, %s3617_s30 }
 0xc97   : > { %1532 = vrot.lane.b32.xlu0 %v2914_v61, %s3617_s30 }
 0xd04   : > { %v1509_v1 = vpop.permute.xlu1 %1508 }
 0xd05   : > { %v1513_v4 = vadd.f32 %v1509_v1, %v1493_v63  ;;  %v1507_v6 = vpop.permute.xlu0 %1506 }
 0xd06   : > { %v1512_v7 = vadd.f32 %v1507_v6, %v1492_v2  ;;  %v3988_v6 = vld [vmem:[%s4594_s14 + $0x8] sm:$0xff] }
 0xd07   : > { %3443 = vtanh.f32 %v1513_v4 }
 0xd08   : > { %3445 = vtanh.f32 %v1512_v7  ;;  %v3913_v9 = vpop.permute.xlu1 %1551  ;;  %v3993_v7 = vld [vmem:[%s4594_s14] sm:$0xff] }
 0xd09   : > { %v3911_v8 = vpop.permute.xlu0 %1532 }
 0xd0a   : > { %v1536_v10 = vmul.f32 %v3911_v8, %v3816_v0  ;;  %v1535_v11 = vmul.f32 %v3911_v8, %v3812_v62  ;;  %v1538_v12 = vmul.f32 %v3911_v8, %v3834_v33  ;;  %v1537_v13 = vmul.f32 %v3911_v8, %v3836_v35 }
 0xd0b   : > { %v1540_v19 = vmul.f32 %v3911_v8, %v3856_v3  ;;  %v1539_v25 = vmul.f32 %v3911_v8, %v3858_v5  ;;  %v1542_v29 = vmul.f32 %v3911_v8, %v3877_v38  ;;  %v1541_v31 = vmul.f32 %v3911_v8, %v3879_v40 }
 0xd0c   : > { %v1555_v15 = vadd.f32 %v3913_v9, %v1536_v10  ;;  %v1554_v22 = vadd.f32 %v3913_v9, %v1535_v11  ;;  %v1557_v20 = vadd.f32 %v3913_v9, %v1538_v12  ;;  %v1556_v24 = vadd.f32 %v3913_v9, %v1537_v13  ;;  %v4001_v13 = vld [vmem:[%s4594_s14 + $0x10] sm:$0xff] }
 0xd0d   : > { %v1559_v28 = vadd.f32 %v3913_v9, %v1540_v19  ;;  %v1558_v30 = vadd.f32 %v3913_v9, %v1539_v25  ;;  %v1561_v34 = vadd.f32 %v3913_v9, %v1542_v29  ;;  %v1560_v36 = vadd.f32 %v3913_v9, %v1541_v31  ;;  %v4039_v31 = vld [vmem:[%s4594_s14 + $0x38] sm:$0xff] }
 0xd0e   : > { %3447 = vtanh.f32 %v1555_v15  ;;  %v4007_v15 = vld [vmem:[%s4594_s14 + $0x18] sm:$0xff] }
 0xd0f   : > { %3449 = vtanh.f32 %v1554_v22 }
 0xd10   : > { %3451 = vtanh.f32 %v1557_v20 }
 0xd11   : > { %v3444_v26 = vpop.eup %3443  ;;  %3453 = vtanh.f32 %v1556_v24 }
 0xd12   : > { %v3446_v27 = vpop.eup %3445  ;;  %1520 = vrot.lane.b32.xlu1 %v3444_v26, %s3616_s1  ;;  %3455 = vtanh.f32 %v1559_v28  ;;  %v4028_v26 = vld [vmem:[%s4594_s14 + $0x30] sm:$0xff] }
 0xd13   : > { %1518 = vrot.lane.b32.xlu0 %v3446_v27, %s3616_s1  ;;  %3457 = vtanh.f32 %v1558_v30  ;;  %s652_s1 = scalar_lea.vmem %s4588_s8, %s4605_s25 }
 0xd14   : > { %3459 = vtanh.f32 %v1561_v34 }
 0xd15   : > { %3461 = vtanh.f32 %v1560_v36 }
 0xd18   : > { %v3448_v37 = vpop.eup %3447 }
 0xd19   : > { %v3450_v39 = vpop.eup %3449  ;;  %1648 = vrot.lane.b32.xlu1 %v3448_v37, %s3615_s20 }
 0xd1a   : > { %1646 = vrot.lane.b32.xlu0 %v3450_v39, %s3615_s20  ;;  %v3452_v41 = vpop.eup %3451 }
 0xd1b   : > { %v3454_v42 = vpop.eup %3453 }
 0xd1c   : > { %v3456_v43 = vpop.eup %3455 }
 0xd1d   : > { %1652 = vrot.lane.b32.xlu1 %v3452_v41, %s3615_s20  ;;  %v3458_v44 = vpop.eup %3457 }
 0xd1e   : > { %1650 = vrot.lane.b32.xlu0 %v3454_v42, %s3615_s20  ;;  %v3460_v45 = vpop.eup %3459 }
 0xd1f   : > { %v3462_v46 = vpop.eup %3461 }
 0xd21   : > { %1656 = vrot.lane.b32.xlu1 %v3456_v43, %s3615_s20  ;;  %v2916_v43 = vld [vmem:[%s652_s1] ss:$0 sm:$0xff] }
 0xd22   : > { %1654 = vrot.lane.b32.xlu0 %v3458_v44, %s3615_s20  ;;  %v2917_v44 = vld [vmem:[%s655_s21] ss:$0 sm:$0xff]  ;;  %s3620_s21 = smov 51  }
 0xd25   : > { %1660 = vrot.lane.b32.xlu1 %v3460_v45, %s3615_s20 }
 0xd26   : > { %1658 = vrot.lane.b32.xlu0 %v3462_v46, %s3615_s20 }
 0xd84   : > { %v1521_v47 = vpop.permute.xlu1 %1520 }
 0xd85   : > { %v3962_v48 = vmul.f32 %v3891_v32, %v1521_v47  ;;  %v1519_v49 = vpop.permute.xlu0 %1518 }
 0xd86   : > { %v3965_v50 = vmul.f32 %v3893_v56, %v1519_v49 }
 0xd87   : > { %v1544_v51 = vmul.f32 %v3911_v8, %v3962_v48 }
 0xd88   : > { %v1543_v52 = vmul.f32 %v3911_v8, %v3965_v50 }
 0xd89   : > { %v1563_v53 = vadd.f32 %v3913_v9, %v1544_v51 }
 0xd8a   : > { %v1562_v54 = vadd.f32 %v3913_v9, %v1543_v52 }
 0xd8b   : > { %3463 = vtanh.f32 %v1563_v53  ;;  %v1649_v55 = vpop.permute.xlu1 %1648 }
 0xd8c   : > { %3465 = vtanh.f32 %v1562_v54  ;;  %v1647_v57 = vpop.permute.xlu0 %1646 }
 0xd8d   : > { %3162 = vmatprep.mubr.msk.f32.mxu0 %vm846_vm1, %v1647_v57 }
 0xd8e   : > { %3163 = vmatmul.mubr.msk.f32.vlgmr.msra.gmra.mrb[10].mxu0 %vm846_vm1, %v1649_v55 }
 0xd8f   : > { %v1653_v32 = vpop.permute.xlu1 %1652 }
 0xd90   : > { %v1651_v56 = vpop.permute.xlu0 %1650 }
 0xd91   : > { %3165 = vmatprep.mubr.msk.f32.mxu1 %vm846_vm1, %v1651_v56 }
 0xd92   : > { %3166 = vmatmul.mubr.msk.f32.vlgmr.msra.gmra.mrb[0].mxu1 %vm846_vm1, %v1653_v32 }
 0xd93   : > { %v1657_v58 = vpop.permute.xlu1 %1656 }
 0xd94   : > { %v1655_v59 = vpop.permute.xlu0 %1654 }
 0xd95   : > { %v3464_v60 = vpop.eup %3463  ;;  %3168 = vmatprep.mubr.msk.f32.mxu1 %vm846_vm1, %v1655_v59 }
 0xd96   : > { %v3466_v61 = vpop.eup %3465  ;;  %3169 = vmatmul.mubr.msk.f32.gmra.mrb[2].mxu1 %vm846_vm1, %v1657_v58  ;;  %1664 = vrot.lane.b32.xlu1 %v3464_v60, %s3615_s20 }
 0xd97   : > { %v1661_v63 = vpop.permute.xlu1 %1660  ;;  %1662 = vrot.lane.b32.xlu0 %v3466_v61, %s3615_s20 }
 0xd98   : > { %v1659_v1 = vpop.permute.xlu0 %1658 }
 0xd99   : > { %3171 = vmatprep.mubr.msk.f32.mxu1 %vm846_vm1, %v1659_v1 }
 0xd9a   : > { %3172 = vmatmul.mubr.msk.f32.gmra.mrb[4].mxu1 %vm846_vm1, %v1661_v63 }
 0xe08   : > { %v1665_v4 = vpop.permute.xlu1 %1664 }
 0xe09   : > { %v1663_v2 = vpop.permute.xlu0 %1662 }
 0xe0a   : > { %3174 = vmatprep.mubr.msk.f32.mxu1 %vm846_vm1, %v1663_v2 }
 0xe0b   : > { %3175 = vmatmul.mubr.msk.f32.gmra.mrb[6].mxu1 %vm846_vm1, %v1665_v4 }
 0xe61   : > { %v3164_v8 = vpop.f32.mrb[10].mxu0 }
 0xe62   : > { %v1902_v9 = vadd.f32 %v3164_v8, %v3988_v6  ;;  %v1792_v10 = vpop.f32.mrb[11].mxu0 }
 0xe63   : > { %v1901_v11 = vadd.f32 %v3993_v7, %v1792_v10 }
 0xe64   : > { %v1925_v12 = vsel %vm1921_vm2, %v1902_v9, -inf }
 0xe65   : > { %1926 = vmax.xlane.f32.xlu1 %v1925_v12  ;;  %v3167_v14 = vpop.f32.mrb[0].mxu1  ;;  %v1922_v17 = vsel %vm1921_vm2, %v1901_v11, -inf }
 0xe66   : > { %1923 = vmax.xlane.f32.xlu0 %v1922_v17  ;;  %v1802_v22 = vpop.f32.mrb[1].mxu1  ;;  %v1904_v19 = vadd.f32 %v3167_v14, %v4007_v15 }
 0xe67   : > { %v1903_v16 = vadd.f32 %v4001_v13, %v1802_v22 }
 0xe68   : > { %v1931_v29 = vsel %vm1921_vm2, %v1904_v19, -inf }
 0xe69   : > { %v3170_v20 = vpop.f32.mrb[2].mxu1  ;;  %v1928_v21 = vsel %vm1921_vm2, %v1903_v16, -inf }
 0xe6a   : > { %1929 = vmax.xlane.f32.xlu0 %v1928_v21  ;;  %v1812_v24 = vpop.f32.mrb[3].mxu1  ;;  %v4031_v27 = vadd.f32 %v3170_v20, %v4020_v23 }
 0xe6b   : > { %v4023_v25 = vadd.f32 %v4013_v18, %v1812_v24 }
 0xe6c   : > { %v1937_v39 = vsel %vm1921_vm2, %v4031_v27, -inf }
 0xe6d   : > { %v3173_v28 = vpop.f32.mrb[4].mxu1  ;;  %v1934_v30 = vsel %vm1921_vm2, %v4023_v25, -inf }
 0xe6e   : > { %1932 = vmax.xlane.f32.xlu0 %v1931_v29  ;;  %1935 = vmax.xlane.f32.xlu1 %v1934_v30  ;;  %v1822_v34 = vpop.f32.mrb[5].mxu1  ;;  %v4045_v37 = vadd.f32 %v3173_v28, %v4039_v31 }
 0xe6f   : > { %v4042_v36 = vadd.f32 %v4028_v26, %v1822_v34 }
 0xe70   : > { %v1943_v42 = vsel %vm1921_vm2, %v4045_v37, -inf }
 0xe71   : > { %v1940_v41 = vsel %vm1921_vm2, %v4042_v36, -inf }
 0xe72   : > { %1938 = vmax.xlane.f32.xlu0 %v1937_v39  ;;  %1941 = vmax.xlane.f32.xlu1 %v1940_v41 }
 0xe76   : > { %1944 = vmax.xlane.f32.xlu0 %v1943_v42 }
 0xe83   : > { %1580 = vrot.lane.b32.xlu1 %v2916_v43, %s3617_s30 }
 0xe8c   : > { %1599 = vrot.lane.b32.xlu0 %v2917_v44, %s3617_s30 }
 0xede   : > { %v3176_v45 = vpop.f32.mrb[6].mxu1 }
 0xedf   : > { %v4063_v46 = vpop.f32.mrb[7].mxu1 }
 0xef2   : > { %v1927_v47 = vpop.xlane.xlu1 %1926 }
 0xef3   : > { %v1953_v49 = vsub.f32 %v1902_v9, %v1927_v47  ;;  %v1924_v51 = vpop.xlane.xlu0 %1923 }
 0xef4   : > { %v1952_v52 = vsub.f32 %v1901_v11, %v1924_v51 }
 0xef5   : > { %v1964_v53 = vmul.f32 1.442695, %v1953_v49 }
 0xef6   : > { %v1962_v54 = vmul.f32 1.442695, %v1952_v52 }
 0xef7   : > { %3467 = vpow2.f32 %v1964_v53  ;;  %v1930_v55 = vpop.xlane.xlu0 %1929 }
 0xef8   : > { %3469 = vpow2.f32 %v1962_v54  ;;  %v1954_v57 = vsub.f32 %v1903_v16, %v1930_v55 }
 0xefa   : > { %v1966_v32 = vmul.f32 1.442695, %v1954_v57 }
 0xefb   : > { %v1936_v56 = vpop.xlane.xlu1 %1935  ;;  %v1933_v58 = vpop.xlane.xlu0 %1932 }
 0xefc   : > { %3471 = vpow2.f32 %v1966_v32  ;;  %v1955_v59 = vsub.f32 %v1904_v19, %v1933_v58  ;;  %v1956_v29 = vsub.f32 %v4023_v25, %v1936_v56  ;;  %v4106_v25 = vld [vmem:[%s4594_s14 + $0x48] sm:$0xff] }
 0xefd   : > { %v4110_v47 = vadd.f32 %v3176_v45, %v4106_v25 }
 0xefe   : > { %v1968_v60 = vmul.f32 1.442695, %v1955_v59  ;;  %v1970_v30 = vmul.f32 1.442695, %v1956_v29  ;;  %v4128_v59 = vld [vmem:[%s4594_s14 + $0x40] sm:$0xff] }
 0xeff   : > { %v1942_v61 = vpop.xlane.xlu1 %1941  ;;  %v1939_v63 = vpop.xlane.xlu0 %1938  ;;  %v1949_v51 = vsel %vm1921_vm2, %v4110_v47, -inf }
 0xf00   : > { %3473 = vpow2.f32 %v1968_v60  ;;  %v1957_v34 = vsub.f32 %v4031_v27, %v1939_v63  ;;  %v1958_v55 = vsub.f32 %v4042_v36, %v1942_v61  ;;  %v4132_v60 = vadd.f32 %v4128_v59, %v4063_v46 }
 0xf01   : > { %v4065_v1 = vpop.eup %3467 }
 0xf02   : > { %v4067_v2 = vpop.eup %3469  ;;  %v1985_v4 = vsel %vm1921_vm2, %v4065_v1, 0.0  ;;  %v1972_v39 = vmul.f32 1.442695, %v1957_v34  ;;  %v1974_v57 = vmul.f32 1.442695, %v1958_v55 }
 0xf03   : > { %1986 = vadd.xlane.f32.xlu0 %v1985_v4  ;;  %v1945_v8 = vpop.xlane.xlu0 %1944  ;;  %v1982_v9 = vsel %vm1921_vm2, %v4067_v2, 0.0  ;;  %v4073_v10 = vpop.permute.xlu1 %1580 }
 0xf04   : > { %1983 = vadd.xlane.f32.xlu1 %v1982_v9  ;;  %v1583_v17 = vmul.f32 %v4073_v10, %v3812_v62  ;;  %v1584_v20 = vmul.f32 %v4073_v10, %v3816_v0  ;;  %v1585_v43 = vmul.f32 %v4073_v10, %v3836_v35  ;;  %v1586_v52 = vmul.f32 %v4073_v10, %v3834_v33 }
 0xf05   : > { %v1959_v32 = vsub.f32 %v4045_v37, %v1945_v8  ;;  %v1946_v37 = vsel %vm1921_vm2, %v4132_v60, -inf  ;;  %v1587_v61 = vmul.f32 %v4073_v10, %v3858_v5  ;;  %v1589_v46 = vmul.f32 %v4073_v10, %v3879_v40 }
 0xf06   : > { %v4075_v11 = vpop.eup %3471 }
 0xf07   : > { %v4077_v12 = vpop.permute.xlu0 %1599  ;;  %v1988_v14 = vsel %vm1921_vm2, %v4075_v11, 0.0  ;;  %v1976_v56 = vmul.f32 1.442695, %v1959_v32  ;;  %v1590_v32 = vmul.f32 %v4073_v10, %v3877_v38 }
 0xf08   : > { %1989 = vadd.xlane.f32.xlu1 %v1988_v14  ;;  %v1602_v22 = vadd.f32 %v4077_v12, %v1583_v17  ;;  %v1603_v21 = vadd.f32 %v4077_v12, %v1584_v20  ;;  %v1604_v27 = vadd.f32 %v4077_v12, %v1585_v43  ;;  %v1605_v54 = vadd.f32 %v4077_v12, %v1586_v52 }
 0xf09   : > { %v1606_v4 = vadd.f32 %v4077_v12, %v1587_v61  ;;  %v1608_v9 = vadd.f32 %v4077_v12, %v1589_v46  ;;  %v1591_v14 = vmul.f32 %v4073_v10, %v3965_v50 }
 0xf0a   : > { %v4084_v16 = vpop.eup %3473  ;;  %3475 = vtanh.f32 %v1602_v22  ;;  %v1588_v22 = vmul.f32 %v4073_v10, %v3856_v3 }
 0xf0b   : > { %v1991_v19 = vsel %vm1921_vm2, %v4084_v16, 0.0  ;;  %3477 = vtanh.f32 %v1603_v21  ;;  %v1610_v17 = vadd.f32 %v4077_v12, %v1591_v14 }
 0xf0c   : > { %1992 = vadd.xlane.f32.xlu0 %v1991_v19  ;;  %3479 = vpow2.f32 %v1970_v30  ;;  %v1607_v19 = vadd.f32 %v4077_v12, %v1588_v22 }
 0xf0d   : > { %3481 = vpow2.f32 %v1972_v39 }
 0xf0e   : > { %3483 = vtanh.f32 %v1604_v27 }
 0xf0f   : > { %3485 = vtanh.f32 %v1605_v54 }
 0xf10   : > { %3487 = vpow2.f32 %v1974_v57 }
 0xf11   : > { %3489 = vpow2.f32 %v1976_v56  ;;  %v1609_v56 = vadd.f32 %v4077_v12, %v1590_v32 }
 0xf12   : > { %3491 = vtanh.f32 %v1606_v4  ;;  %v2949_v4 = vld [vmem:[%s658_s18] ss:$0 sm:$0xff] }
 0xf13   : > { %3493 = vtanh.f32 %v1608_v9 }
 0xf14   : > { %v3476_v24 = vpop.eup %3475  ;;  %3495 = vtanh.f32 %v1610_v17 }
 0xf15   : > { %v3478_v28 = vpop.eup %3477  ;;  %3497 = vtanh.f32 %v1607_v19 }
 0xf16   : > { %v4095_v41 = vpop.eup %3479 }
 0xf17   : > { %v1994_v42 = vsel %vm1921_vm2, %v4095_v41, 0.0  ;;  %v4101_v44 = vpop.eup %3481 }
 0xf18   : > { %v1997_v49 = vsel %vm1921_vm2, %v4101_v44, 0.0  ;;  %v3484_v53 = vpop.eup %3483 }
 0xf19   : > { %1666 = vrot.lane.b32.xlu1 %v3476_v24, %s3615_s20  ;;  %v3486_v45 = vpop.eup %3485 }
 0xf1a   : > { %v4123_v58 = vpop.eup %3487 }
 0xf1b   : > { %v2000_v36 = vsel %vm1921_vm2, %v4123_v58, 0.0  ;;  %v4140_v63 = vpop.eup %3489 }
 0xf1c   : > { %v2003_v8 = vsel %vm1921_vm2, %v4140_v63, 0.0  ;;  %v3492_v20 = vpop.eup %3491 }
 0xf1d   : > { %v3494_v21 = vpop.eup %3493 }
 0xf1e   : > { %v3496_v24 = vpop.eup %3495 }
 0xf22   : > { %1668 = vrot.lane.b32.xlu0 %v3478_v28, %s3615_s20  ;;  %v3498_v28 = vpop.eup %3497 }
 0xf3d   : > { %1995 = vadd.xlane.f32.xlu1 %v1994_v42 }
 0xf41   : > { %1998 = vadd.xlane.f32.xlu0 %v1997_v49 }
 0xf45   : > { %1950 = vmax.xlane.f32.xlu0 %v1949_v51 }
 0xf4e   : > { %1670 = vrot.lane.b32.xlu1 %v3484_v53, %s3615_s20 }
 0xf5b   : > { %1672 = vrot.lane.b32.xlu0 %v3486_v45, %s3615_s20 }
 0xf72   : > { %2001 = vadd.xlane.f32.xlu1 %v2000_v36  ;;  %v2032_v36 = vld [vmem:[%s4592_s12] sm:$0xff] }
 0xf76   : > { %1947 = vmax.xlane.f32.xlu1 %v1946_v37  ;;  %v2033_v37 = vld [vmem:[%s4592_s12 + $0x8] sm:$0x3] }
 0xf77   : > { %v3306_v61 = vpack.c.bf16 %v2033_v37, %v2032_v36 }
 0xf79   : > { %3308 = vmatprep.subr.msk.bf16.mxu1 %vm3307_vm5, %v3306_v61 }
 0xf7a   : > { %2004 = vadd.xlane.f32.xlu0 %v2003_v8  ;;  %3311 = vmatpush3.bf16.msk.msra.mxu1 %vm3307_vm5, %v3306_v61 }
 0xf87   : > { %1674 = vrot.lane.b32.xlu1 %v3492_v20, %s3615_s20 }
 0xf8b   : > { %1678 = vrot.lane.b32.xlu1 %v3494_v21, %s3615_s20 }
 0xf8f   : > { %1682 = vrot.lane.b32.xlu1 %v3496_v24, %s3615_s20 }
 0xf90   : > { %1676 = vrot.lane.b32.xlu0 %v3498_v28, %s3615_s20  ;;  %v4162_v34 = vpop.xlane.xlu0 %1986 }
 0xf91   : > { %v4158_v29 = vpop.xlane.xlu1 %1983 }
 0xf95   : > { %v4160_v30 = vpop.xlane.xlu1 %1989 }
 0xf99   : > { %v1667_v39 = vpop.permute.xlu1 %1666  ;;  %v4164_v42 = vpop.xlane.xlu0 %1992 }
 0xf9a   : > { %3177 = vmatprep.mubr.msk.f32.mxu1 %vm846_vm1, %v1667_v39 }
 0xf9d   : > { %v1669_v43 = vpop.permute.xlu0 %1668 }
 0xf9e   : > { %3178 = vmatmul.mubr.msk.f32.gmra.mrb[8].mxu1 %vm846_vm1, %v1669_v43  ;;  %v2950_v43 = vld [vmem:[%s661_s0] ss:$0 sm:$0xff]  ;;  %s3352_s0 = smul.u32 80, %s4605_s25 }
 0xfa0   : > { %s4546_s19 = scalar_lea.vmem %s4597_s17, %s3352_s0 }
 0xfca   : > { %v1996_v27 = vpop.xlane.xlu1 %1995 }
 0xfce   : > { %v1671_v49 = vpop.permute.xlu1 %1670  ;;  %v4168_v51 = vpop.xlane.xlu0 %1998 }
 0xfcf   : > { %3180 = vmatprep.mubr.msk.f32.mxu1 %vm846_vm1, %v1671_v49 }
 0xfd2   : > { %v1951_v52 = vpop.xlane.xlu0 %1950 }
 0xfd3   : > { %v1961_v53 = vsub.f32 %v4110_v47, %v1951_v52 }
 0xfd5   : > { %v1980_v54 = vmul.f32 1.442695, %v1961_v53 }
 0xfd6   : > { %v1673_v45 = vpop.permute.xlu0 %1672 }
 0xfd7   : > { %3499 = vpow2.f32 %v1980_v54  ;;  %3181 = vmatmul.mubr.msk.f32.gmra.mrb[10].mxu1 %vm846_vm1, %v1673_v45 }
 0xfd8   : > { %3501 = vtanh.f32 %v1609_v56 }
 0xfe1   : > { %v4173_v55 = vpop.eup %3499 }
 0xfe2   : > { %v2009_v57 = vsel %vm1921_vm2, %v4173_v55, 0.0  ;;  %v3502_v47 = vpop.eup %3501 }
 0xfe3   : > { %2010 = vadd.xlane.f32.xlu0 %v2009_v57 }
 0xff9   : > { %1680 = vrot.lane.b32.xlu0 %v3502_v47, %s3615_s20 }
 0xffd   : > { %2240 = vrot.lane.b32.xlu0 %v2949_v4, %s3617_s30 }
 0xfff   : > { %v2002_v8 = vpop.xlane.xlu1 %2001 }
0x1003   : > { %v1948_v46 = vpop.xlane.xlu1 %1947 }
0x1004   : > { %v1960_v9 = vsub.f32 %v4132_v60, %v1948_v46  ;;  %v1592_v60 = vmul.f32 %v4073_v10, %v3962_v48 }
0x1006   : > { %v1978_v14 = vmul.f32 1.442695, %v1960_v9  ;;  %v1611_v28 = vadd.f32 %v4077_v12, %v1592_v60 }
0x1007   : > { %v1675_v17 = vpop.permute.xlu1 %1674  ;;  %v2005_v22 = vpop.xlane.xlu0 %2004 }
0x1008   : > { %3503 = vpow2.f32 %v1978_v14  ;;  %3183 = vmatprep.mubr.msk.f32.mxu1 %vm846_vm1, %v1675_v17 }
0x1009   : > { %3505 = vtanh.f32 %v1611_v28 }
0x100a   : > { %3507 = vrcp.f32 %v4158_v29 }
0x100b   : > { %v1679_v19 = vpop.permute.xlu1 %1678  ;;  %v1677_v20 = vpop.permute.xlu0 %1676  ;;  %3509 = vrcp.f32 %v4162_v34 }
0x100c   : > { %3184 = vmatmul.mubr.msk.f32.gmra.mrb[12].mxu1 %vm846_vm1, %v1677_v20  ;;  %3511 = vrcp.f32 %v4160_v30 }
0x100d   : > { %3186 = vmatprep.mubr.msk.f32.mxu1 %vm846_vm1, %v1679_v19  ;;  %3513 = vrcp.f32 %v4164_v42 }
0x100e   : > { %3515 = vrcp.f32 %v1996_v27 }
0x100f   : > { %v1683_v10 = vpop.permute.xlu1 %1682  ;;  %3517 = vrcp.f32 %v4168_v51 }
0x1010   : > { %3519 = vrcp.f32 %v2002_v8 }
0x1011   : > { %3521 = vrcp.f32 %v2005_v22 }
0x1012   : > { %v4196_v21 = vpop.eup %3503 }
0x1013   : > { %v2006_v24 = vsel %vm1921_vm2, %v4196_v21, 0.0  ;;  %v3506_v39 = vpop.eup %3505 }
0x1014   : > { %2007 = vadd.xlane.f32.xlu1 %v2006_v24  ;;  %v3508_v45 = vpop.eup %3507 }
0x1015   : > { %v3510_v57 = vpop.eup %3509  ;;  %v2022_v47 = vmul.f32 %v3508_v45, %v4067_v2 }
0x1016   : > { %v3512_v36 = vpop.eup %3511  ;;  %v2023_v29 = vmul.f32 %v3510_v57, %v4065_v1 }
0x1017   : > { %v3514_v34 = vpop.eup %3513  ;;  %v2024_v27 = vmul.f32 %v3512_v36, %v4075_v11 }
0x1018   : > { %v3516_v51 = vpop.eup %3515 }
0x1019   : > { %v3518_v4 = vpop.eup %3517  ;;  %v2026_v8 = vmul.f32 %v3516_v51, %v4095_v41 }
0x101a   : > { %v3520_v46 = vpop.eup %3519  ;;  %v2027_v9 = vmul.f32 %v3518_v4, %v4101_v44 }
0x101b   : > { %v2028_v17 = vmul.f32 %v3520_v46, %v4123_v58  ;;  %v2402_v46 = vld [vmem:[%s4595_s15 + $0x8] sm:$0xff] }
0x1025   : > { %1684 = vrot.lane.b32.xlu1 %v3506_v39, %s3615_s20 }
0x1029   : > { %2258 = vrot.lane.b32.xlu1 %v2950_v43, %s3617_s30  ;;  %s3619_s30 = smov 123  }
0x1070   : > { %v2011_v49 = vpop.xlane.xlu0 %2010 }
0x1071   : > { %v4209_v52 = vpop.f32.mrb[8].mxu1 }
0x1072   : > { %v4211_v53 = vpop.f32.mrb[9].mxu1 }
0x1074   : > { %v1681_v54 = vpop.permute.xlu0 %1680 }
0x1075   : > { %3187 = vmatmul.mubr.msk.f32.gmra.mrb[14].mxu1 %vm846_vm1, %v1681_v54 }
0x1076   : > { %3189 = vmatprep.mubr.msk.f32.mxu1 %vm846_vm1, %v1683_v10 }
0x1078   : > { %v4220_v32 = vpop.permute.xlu0 %2240 }
0x1079   : > { %v2243_v30 = vmul.f32 %v4220_v32, %v3812_v62  ;;  %v2244_v37 = vmul.f32 %v4220_v32, %v3816_v0  ;;  %v2025_v62 = vmul.f32 %v3514_v34, %v4084_v16  ;;  %v2245_v0 = vmul.f32 %v4220_v32, %v3836_v35  ;;  %v3522_v16 = vpop.eup %3521 }
0x107a   : > { %v2246_v41 = vmul.f32 %v4220_v32, %v3834_v33  ;;  %v2029_v35 = vmul.f32 %v3522_v16, %v4140_v63  ;;  %v2247_v58 = vmul.f32 %v4220_v32, %v3858_v5  ;;  %v2249_v39 = vmul.f32 %v4220_v32, %v3879_v40 }
0x107b   : > { %v2251_v10 = vmul.f32 %v4220_v32, %v3965_v50  ;;  %v2252_v45 = vmul.f32 %v4220_v32, %v3962_v48  ;;  %v1911_v48 = vadd.f32 %v3993_v7, %v4211_v53 }
0x10a1   : > { %v2008_v12 = vpop.xlane.xlu1 %2007 }
0x10a2   : > { %3523 = vrcp.f32 %v2008_v12 }
0x10a3   : > { %3525 = vrcp.f32 %v2011_v49  ;;  %v2250_v49 = vmul.f32 %v4220_v32, %v3877_v38 }
0x10a5   : > { %v1685_v56 = vpop.permute.xlu1 %1684 }
0x10a6   : > { %3190 = vmatmul.mubr.msk.f32.gmra.mrb[16].mxu1 %vm846_vm1, %v1685_v56 }
0x10a7   : > { %3196 = vmatprep.mubr.msk.f32.mxu1 %vm1921_vm2, %v2022_v47 }
0x10a9   : > { %v4228_v42 = vpop.permute.xlu1 %2258 }
0x10aa   : > { %3197 = vmatmul.mubr.msk.f32.vlgmr.msra.gmra.mrb[18].mxu1 %vm1921_vm2, %v2023_v29  ;;  %v2261_v2 = vadd.f32 %v4228_v42, %v2243_v30  ;;  %v4235_v61 = vpop.f32.mrb[10].mxu1  ;;  %v2262_v11 = vadd.f32 %v4228_v42, %v2244_v37  ;;  %v2263_v14 = vadd.f32 %v4228_v42, %v2245_v0  ;;  %v2264_v19 = vadd.f32 %v4228_v42, %v2246_v41 }
0x10ab   : > { %3199 = vmatprep.mubr.msk.f32.mxu1 %vm1921_vm2, %v2024_v27  ;;  %v4238_v1 = vpop.f32.mrb[11].mxu1  ;;  %v2265_v63 = vadd.f32 %v4228_v42, %v2247_v58  ;;  %v2269_v40 = vadd.f32 %v4228_v42, %v2251_v10  ;;  %v2270_v38 = vadd.f32 %v4228_v42, %v2252_v45 }
0x10ac   : > { %3527 = vtanh.f32 %v2261_v2  ;;  %v3524_v22 = vpop.eup %3523  ;;  %v1913_v29 = vadd.f32 %v4001_v13, %v4238_v1 }
0x10ad   : > { %3529 = vtanh.f32 %v2262_v11  ;;  %v3526_v44 = vpop.eup %3525  ;;  %v2030_v20 = vmul.f32 %v3524_v22, %v4196_v21  ;;  %v2248_v21 = vmul.f32 %v4220_v32, %v3856_v3  ;;  %v2268_v3 = vadd.f32 %v4228_v42, %v2250_v49 }
0x10ae   : > { %3200 = vmatmul.mubr.msk.f32.gmra.mrb[20].mxu1 %vm1921_vm2, %v2025_v62  ;;  %3531 = vtanh.f32 %v2263_v14  ;;  %v2031_v33 = vmul.f32 %v3526_v44, %v4173_v55  ;;  %v2267_v55 = vadd.f32 %v4228_v42, %v2249_v39  ;;  %v2404_v14 = vld [vmem:[%s4595_s15 + $0x18] sm:$0xff]  ;;  %v2406_v44 = vld [vmem:[%s4595_s15 + $0x28] sm:$0xff] }
0x10af   : > { %3202 = vmatprep.mubr.msk.f32.mxu1 %vm1921_vm2, %v2026_v8  ;;  %3533 = vtanh.f32 %v2264_v19  ;;  %v2266_v5 = vadd.f32 %v4228_v42, %v2248_v21  ;;  %v2405_v19 = vld [vmem:[%s4595_s15 + $0x20] sm:$0xff]  ;;  %v2408_v39 = vld [vmem:[%s4595_s15 + $0x38] sm:$0xff] }
0x10b0   : > { %3535 = vtanh.f32 %v2265_v63 }
0x10b1   : > { %3537 = vtanh.f32 %v2266_v5 }
0x10b2   : > { %3203 = vmatmul.mubr.msk.f32.gmra.mrb[22].mxu1 %vm1921_vm2, %v2027_v9  ;;  %3539 = vtanh.f32 %v2267_v55  ;;  %v2403_v9 = vld [vmem:[%s4595_s15 + $0x10] sm:$0xff] }
0x10b3   : > { %3205 = vmatprep.mubr.msk.f32.mxu1 %vm1921_vm2, %v2028_v17  ;;  %3541 = vtanh.f32 %v2268_v3  ;;  %v3316_v17 = vpack.c.bf16 %v2404_v14, %v2403_v9 }
0x10b4   : > { %3543 = vtanh.f32 %v2269_v40 }
0x10b5   : > { %3545 = vtanh.f32 %v2270_v38 }
0x10b6   : > { %v3528_v24 = vpop.eup %3527  ;;  %3206 = vmatmul.mubr.msk.f32.gmra.mrb[24].mxu1 %vm1921_vm2, %v2029_v35 }
0x10b7   : > { %3208 = vmatprep.mubr.msk.f32.mxu1 %vm1921_vm2, %v2030_v20  ;;  %2321 = vrot.lane.b32.xlu0 %v3528_v24, %s3615_s20  ;;  %v3530_v60 = vpop.eup %3529  ;;  %v3320_v20 = vpack.c.bf16 %v2406_v44, %v2405_v19 }
0x10b8   : > { %v3532_v28 = vpop.eup %3531 }
0x10b9   : > { %v3534_v43 = vpop.eup %3533 }
0x10ba   : > { %3209 = vmatmul.mubr.msk.f32.gmra.mrb[26].mxu1 %vm1921_vm2, %v2031_v33  ;;  %v3536_v54 = vpop.eup %3535 }
0x10bb   : > { %2323 = vrot.lane.b32.xlu0 %v3530_v60, %s3615_s20  ;;  %v3538_v12 = vpop.eup %3537 }
0x10bc   : > { %v3540_v57 = vpop.eup %3539 }
0x10bd   : > { %v3542_v56 = vpop.eup %3541 }
0x10be   : > { %v3544_v50 = vpop.eup %3543 }
0x10bf   : > { %2325 = vrot.lane.b32.xlu0 %v3532_v28, %s3615_s20  ;;  %v3546_v47 = vpop.eup %3545  ;;  %v2407_v28 = vld [vmem:[%s4595_s15 + $0x30] sm:$0xff] }
0x10c3   : > { %2327 = vrot.lane.b32.xlu0 %v3534_v43, %s3615_s20  ;;  %v3324_v43 = vpack.c.bf16 %v2408_v39, %v2407_v28 }
0x10c7   : > { %2329 = vrot.lane.b32.xlu0 %v3536_v54, %s3615_s20 }
0x10cb   : > { %2331 = vrot.lane.b32.xlu0 %v3538_v12, %s3615_s20 }
0x10cf   : > { %2333 = vrot.lane.b32.xlu0 %v3540_v57, %s3615_s20 }
0x10d3   : > { %2335 = vrot.lane.b32.xlu0 %v3542_v56, %s3615_s20 }
0x10d7   : > { %2337 = vrot.lane.b32.xlu0 %v3544_v50, %s3615_s20 }
0x10db   : > { %2339 = vrot.lane.b32.xlu0 %v3546_v47, %s3615_s20 }
0x10df   : > { %2193 = vrot.lane.b32.xlu0 %v1911_v48, %s3619_s30  ;;  %v4292_v36 = vpop.f32.mrb[12].mxu1 }
0x10e0   : > { %v1862_v30 = vpop.f32.mrb[13].mxu1  ;;  %v1916_v28 = vadd.f32 %v4292_v36, %v4020_v23 }
0x10e1   : > { %v4298_v34 = vadd.f32 %v4013_v18, %v1862_v30 }
0x10e3   : > { %2197 = vrot.lane.b32.xlu0 %v1913_v29, %s3619_s30 }
0x10e7   : > { %2201 = vrot.lane.b32.xlu0 %v4298_v34, %s3619_s30 }
0x1129   : > { %v4302_v27 = vpop.permute.xlu0 %2321 }
0x112d   : > { %v4304_v7 = vpop.permute.xlu0 %2323 }
0x1131   : > { %v4306_v53 = vpop.permute.xlu0 %2325 }
0x1135   : > { %v4315_v18 = vpop.permute.xlu0 %2327 }
0x1139   : > { %v4317_v37 = vpop.permute.xlu0 %2329 }
0x113d   : > { %v4319_v1 = vpop.permute.xlu0 %2331 }
0x1141   : > { %v4321_v62 = vpop.permute.xlu0 %2333 }
0x1145   : > { %v4323_v11 = vpop.permute.xlu0 %2335 }
0x1148   : > { %v4308_v51 = vpop.f32.mrb[14].mxu1 }
0x1149   : > { %v1872_v2 = vpop.f32.mrb[15].mxu1  ;;  %v4325_v4 = vpop.permute.xlu0 %2337 }
0x114a   : > { %v4311_v13 = vadd.f32 %v4028_v26, %v1872_v2  ;;  %v2401_v26 = vld [vmem:[%s4595_s15] sm:$0xff] }
0x114b   : > { %v3312_v0 = vpack.c.bf16 %v2402_v46, %v2401_v26 }
0x114c   : > { %2205 = vrot.lane.b32.xlu0 %v4311_v13, %s3619_s30 }
0x114d   : > { %v4327_v8 = vpop.permute.xlu0 %2339  ;;  %3313 = vmatprep.subr.bf16.mxu1 %v3312_v0 }
0x114e   : > { %3315 = vmatpush3.bf16.msra.mxu1 %v3312_v0 }
0x114f   : > { %3317 = vmatprep.subr.bf16.mxu1 %v3316_v17 }
0x1151   : > { %v2194_v16 = vpop.permute.xlu0 %2193 }
0x1152   : > { %3319 = vmatpush3.bf16.msra.mxu1 %v3316_v17  ;;  %v2223_v63 = vmax.f32 %v1911_v48, %v2194_v16 }
0x1153   : > { %3321 = vmatprep.subr.bf16.mxu1 %v3320_v20 }
0x1155   : > { %v2198_v58 = vpop.permute.xlu0 %2197 }
0x1156   : > { %3323 = vmatpush3.bf16.msra.mxu1 %v3320_v20  ;;  %v2225_v49 = vmax.f32 %v1913_v29, %v2198_v58 }
0x1157   : > { %3325 = vmatprep.subr.bf16.mxu1 %v3324_v43 }
0x1159   : > { %v2202_v10 = vpop.permute.xlu0 %2201 }
0x115a   : > { %3327 = vmatpush3.bf16.msra.mxu1 %v3324_v43  ;;  %v2227_v45 = vmax.f32 %v4298_v34, %v2202_v10 }
0x1179   : > { %v4341_v22 = vpop.f32.mrb[16].mxu1 }
0x117a   : > { %v1882_v41 = vpop.f32.mrb[17].mxu1 }
0x117b   : > { %v4344_v35 = vadd.f32 %v4128_v59, %v1882_v41 }
0x117d   : > { %v3198_v24 = vpop.f32.mrb[18].mxu1  ;;  %2209 = vrot.lane.b32.xlu0 %v4344_v35, %s3619_s30 }
0x117e   : > { %v2134_v33 = vpop.f32.mrb[19].mxu1  ;;  %v2282_v59 = vmul.f32 %v3198_v24, %v4220_v32 }
0x117f   : > { %v2281_v60 = vmul.f32 %v4220_v32, %v2134_v33 }
0x1180   : > { %v2292_v3 = vadd.f32 %v2282_v59, %v4228_v42 }
0x1181   : > { %v2291_v21 = vadd.f32 %v2281_v60, %v4228_v42  ;;  %v3201_v5 = vpop.f32.mrb[20].mxu1  ;;  %2571 = vrot.lane.b32.xlu0 %v2223_v63, %s3620_s21 }
0x1182   : > { %v2144_v55 = vpop.f32.mrb[21].mxu1  ;;  %v2284_v38 = vmul.f32 %v3201_v5, %v4220_v32 }
0x1183   : > { %3547 = vtanh.f32 %v2291_v21  ;;  %v2283_v54 = vmul.f32 %v4220_v32, %v2144_v55  ;;  %v1918_v55 = vadd.f32 %v4308_v51, %v4039_v31 }
0x1184   : > { %3549 = vtanh.f32 %v2292_v3  ;;  %v2294_v47 = vadd.f32 %v2284_v38, %v4228_v42 }
0x1185   : > { %v3204_v40 = vpop.f32.mrb[22].mxu1  ;;  %2575 = vrot.lane.b32.xlu0 %v2225_v49, %s3620_s21  ;;  %v2293_v57 = vadd.f32 %v2283_v54, %v4228_v42 }
0x1186   : > { %v2154_v12 = vpop.f32.mrb[23].mxu1  ;;  %v2286_v34 = vmul.f32 %v3204_v40, %v4220_v32 }
0x1187   : > { %3551 = vtanh.f32 %v2293_v57  ;;  %v2285_v48 = vmul.f32 %v4220_v32, %v2154_v12 }
0x1188   : > { %3553 = vtanh.f32 %v2294_v47  ;;  %v2296_v0 = vadd.f32 %v2286_v34, %v4228_v42  ;;  %v2951_v47 = vld [vmem:[%s4596_s16] ss:$0 sm:$0xff] }
0x1189   : > { %v3207_v56 = vpop.f32.mrb[24].mxu1  ;;  %2579 = vrot.lane.b32.xlu0 %v2227_v45, %s3620_s21  ;;  %v2295_v26 = vadd.f32 %v2285_v48, %v4228_v42 }
0x118a   : > { %v2164_v50 = vpop.f32.mrb[25].mxu1  ;;  %v2288_v16 = vmul.f32 %v3207_v56, %v4220_v32 }
0x118b   : > { %3555 = vtanh.f32 %v2295_v26  ;;  %v2287_v9 = vmul.f32 %v4220_v32, %v2164_v50 }
0x118c   : > { %3557 = vtanh.f32 %v2296_v0  ;;  %v2298_v19 = vadd.f32 %v2288_v16, %v4228_v42 }
0x118d   : > { %v3548_v29 = vpop.eup %3547  ;;  %v3210_v30 = vpop.f32.mrb[26].mxu1  ;;  %v2297_v17 = vadd.f32 %v2287_v9, %v4228_v42 }
0x118e   : > { %v2174_v2 = vpop.f32.mrb[27].mxu1  ;;  %2361 = vrot.lane.b32.xlu1 %v3548_v29, %s3615_s20  ;;  %v3550_v46 = vpop.eup %3549  ;;  %v2290_v24 = vmul.f32 %v3210_v30, %v4220_v32 }
0x118f   : > { %3559 = vtanh.f32 %v2297_v17  ;;  %v2289_v44 = vmul.f32 %v4220_v32, %v2174_v2  ;;  %v1912_v32 = vadd.f32 %v4209_v52, %v3988_v6  ;;  %v1920_v6 = vadd.f32 %v4341_v22, %v4106_v25 }
0x1190   : > { %3561 = vtanh.f32 %v2298_v19  ;;  %v2300_v63 = vadd.f32 %v2290_v24, %v4228_v42 }
0x1191   : > { %v3552_v14 = vpop.eup %3551  ;;  %v2299_v58 = vadd.f32 %v2289_v44, %v4228_v42  ;;  %v1914_v42 = vadd.f32 %v4235_v61, %v4007_v15 }
0x1192   : > { %2363 = vrot.lane.b32.xlu1 %v3550_v46, %s3615_s20  ;;  %v3554_v41 = vpop.eup %3553 }
0x1193   : > { %3563 = vtanh.f32 %v2299_v58 }
0x1194   : > { %3565 = vtanh.f32 %v2300_v63 }
0x1195   : > { %v3556_v20 = vpop.eup %3555 }
0x1196   : > { %2365 = vrot.lane.b32.xlu1 %v3552_v14, %s3615_s20  ;;  %v3558_v33 = vpop.eup %3557 }
0x1199   : > { %v3560_v59 = vpop.eup %3559 }
0x119a   : > { %2367 = vrot.lane.b32.xlu1 %v3554_v41, %s3615_s20  ;;  %v3562_v60 = vpop.eup %3561 }
0x119d   : > { %v3564_v21 = vpop.eup %3563 }
0x119e   : > { %2369 = vrot.lane.b32.xlu1 %v3556_v20, %s3615_s20  ;;  %v3566_v5 = vpop.eup %3565 }
0x11a2   : > { %2371 = vrot.lane.b32.xlu1 %v3558_v33, %s3615_s20 }
0x11a6   : > { %2373 = vrot.lane.b32.xlu1 %v3560_v59, %s3615_s20 }
0x11aa   : > { %2375 = vrot.lane.b32.xlu1 %v3562_v60, %s3615_s20 }
0x11ae   : > { %2377 = vrot.lane.b32.xlu1 %v3564_v21, %s3615_s20 }
0x11b2   : > { %2379 = vrot.lane.b32.xlu1 %v3566_v5, %s3615_s20 }
0x11b6   : > { %2195 = vrot.lane.b32.xlu1 %v1912_v32, %s3619_s30 }
0x11ba   : > { %2199 = vrot.lane.b32.xlu1 %v1914_v42, %s3619_s30 }
0x11be   : > { %2203 = vrot.lane.b32.xlu1 %v1916_v28, %s3619_s30  ;;  %v2206_v39 = vpop.permute.xlu0 %2205 }
0x11bf   : > { %v2229_v43 = vmax.f32 %v4311_v13, %v2206_v39 }
0x11c1   : > { %2583 = vrot.lane.b32.xlu0 %v2229_v43, %s3620_s21 }
0x11c2   : > { %2207 = vrot.lane.b32.xlu1 %v1918_v55, %s3619_s30 }
0x11c6   : > { %2211 = vrot.lane.b32.xlu1 %v1920_v6, %s3619_s30 }
0x11ef   : > { %v2210_v15 = vpop.permute.xlu0 %2209 }
0x11f0   : > { %v2231_v23 = vmax.f32 %v4344_v35, %v2210_v15 }
0x11f2   : > { %2587 = vrot.lane.b32.xlu0 %v2231_v23, %s3620_s21 }
0x11f3   : > { %v2572_v26 = vpop.permute.xlu0 %2571 }
0x11f7   : > { %v2576_v44 = vpop.permute.xlu0 %2575 }
0x1200   : > { %v2362_v52 = vpop.permute.xlu1 %2361 }
0x1201   : > { %v2391_v31 = vsel %vm846_vm1, %v4302_v27, %v2362_v52 }
0x1202   : > { %3227 = vmatprep.mubr.msk.f32.mxu1 %vm692_vm0, %v2391_v31 }
0x1204   : > { %v2364_v61 = vpop.permute.xlu1 %2363 }
0x1205   : > { %v2392_v36 = vsel %vm846_vm1, %v4304_v7, %v2364_v61 }
0x1206   : > { %3228 = vmatmul.mubr.msk.f32.vlgmr.msra.gmra.mrb[28].mxu1 %vm692_vm0, %v2392_v36 }
0x1208   : > { %v2366_v25 = vpop.permute.xlu1 %2365 }
0x1209   : > { %v2393_v51 = vsel %vm846_vm1, %v4306_v53, %v2366_v25 }
0x120a   : > { %3230 = vmatprep.mubr.msk.f32.mxu1 %vm692_vm0, %v2393_v51 }
0x120c   : > { %v2368_v13 = vpop.permute.xlu1 %2367 }
0x120d   : > { %v2394_v22 = vsel %vm846_vm1, %v4315_v18, %v2368_v13 }
0x120e   : > { %3231 = vmatmul.mubr.msk.f32.gmra.mrb[30].mxu1 %vm692_vm0, %v2394_v22 }
0x1210   : > { %v2370_v27 = vpop.permute.xlu1 %2369 }
0x1211   : > { %v2395_v35 = vsel %vm846_vm1, %v4317_v37, %v2370_v27 }
0x1212   : > { %3233 = vmatprep.mubr.msk.f32.mxu1 %vm692_vm0, %v2395_v35 }
0x1214   : > { %v2372_v7 = vpop.permute.xlu1 %2371 }
0x1215   : > { %v2396_v49 = vsel %vm846_vm1, %v4319_v1, %v2372_v7 }
0x1216   : > { %3234 = vmatmul.mubr.msk.f32.gmra.mrb[32].mxu1 %vm692_vm0, %v2396_v49 }
0x1218   : > { %v2374_v53 = vpop.permute.xlu1 %2373 }
0x1219   : > { %v2397_v3 = vsel %vm846_vm1, %v4321_v62, %v2374_v53 }
0x121a   : > { %3236 = vmatprep.mubr.msk.f32.mxu1 %vm692_vm0, %v2397_v3 }
0x121c   : > { %v2376_v18 = vpop.permute.xlu1 %2375 }
0x121d   : > { %v2398_v54 = vsel %vm846_vm1, %v4323_v11, %v2376_v18 }
0x121e   : > { %3237 = vmatmul.mubr.msk.f32.gmra.mrb[34].mxu1 %vm692_vm0, %v2398_v54 }
0x1220   : > { %v2378_v37 = vpop.permute.xlu1 %2377 }
0x1221   : > { %v2399_v10 = vsel %vm846_vm1, %v4325_v4, %v2378_v37 }
0x1222   : > { %3239 = vmatprep.mubr.msk.f32.mxu1 %vm692_vm0, %v2399_v10 }
0x1224   : > { %v2380_v1 = vpop.permute.xlu1 %2379 }
0x1225   : > { %v2400_v40 = vsel %vm846_vm1, %v4327_v8, %v2380_v1 }
0x1226   : > { %3240 = vmatmul.mubr.msk.f32.gmra.mrb[36].mxu1 %vm692_vm0, %v2400_v40 }
0x1228   : > { %v2196_v62 = vpop.permute.xlu1 %2195 }
0x1229   : > { %v2224_v12 = vmax.f32 %v1912_v32, %v2196_v62 }
0x122b   : > { %2573 = vrot.lane.b32.xlu1 %v2224_v12, %s3620_s21 }
0x122c   : > { %v2200_v45 = vpop.permute.xlu1 %2199 }
0x122d   : > { %v2226_v11 = vmax.f32 %v1914_v42, %v2200_v45  ;;  %v2580_v42 = vpop.permute.xlu0 %2579 }
0x122f   : > { %2577 = vrot.lane.b32.xlu1 %v2226_v11, %s3620_s21 }
0x1230   : > { %v2204_v38 = vpop.permute.xlu1 %2203 }
0x1231   : > { %v2228_v57 = vmax.f32 %v1916_v28, %v2204_v38 }
0x1233   : > { %2581 = vrot.lane.b32.xlu1 %v2228_v57, %s3620_s21  ;;  %v2584_v61 = vpop.permute.xlu0 %2583 }
0x1234   : > { %v2208_v4 = vpop.permute.xlu1 %2207 }
0x1235   : > { %v2230_v56 = vmax.f32 %v1918_v55, %v2208_v4 }
0x1237   : > { %2585 = vrot.lane.b32.xlu1 %v2230_v56, %s3620_s21 }
0x1238   : > { %v2212_v50 = vpop.permute.xlu1 %2211 }
0x1239   : > { %v2232_v8 = vmax.f32 %v1920_v6, %v2212_v50 }
0x123b   : > { %2589 = vrot.lane.b32.xlu1 %v2232_v8, %s3620_s21 }
0x1264   : > { %v2588_v53 = vpop.permute.xlu0 %2587 }
0x129d   : > { %v2574_v2 = vpop.permute.xlu1 %2573 }
0x12a1   : > { %v2578_v20 = vpop.permute.xlu1 %2577 }
0x12a5   : > { %v2582_v5 = vpop.permute.xlu1 %2581 }
0x12a9   : > { %v2586_v52 = vpop.permute.xlu1 %2585 }
0x12ad   : > { %v2590_v7 = vpop.permute.xlu1 %2589 }
0x12d9   : > { %v3229_v48 = vpop.f32.mrb[28].mxu1 }
0x12da   : > { %v2518_v29 = vadd.f32 %v3229_v48, %v2951_v47  ;;  %v2512_v30 = vpop.f32.mrb[29].mxu1 }
0x12db   : > { %v2513_v34 = vadd.f32 %v2951_v47, %v2512_v30 }
0x12dc   : > { %v2603_v46 = vsel %vm2601_vm6, %v2518_v29, %v2574_v2 }
0x12dd   : > { %v4453_v0 = vsel %vm2612_vm7, %v2603_v46, -inf  ;;  %v2602_v9 = vsel %vm2601_vm6, %v2513_v34, %v2572_v26 }
0x12de   : > { %2625 = vmax.xlane.f32.xlu1 %v4453_v0  ;;  %v4458_v14 = vsel %vm2612_vm7, %v2602_v9, -inf }
0x12df   : > { %2623 = vmax.xlane.f32.xlu0 %v4458_v14 }
0x12e1   : > { %v3232_v16 = vpop.f32.mrb[30].mxu1 }
0x12e2   : > { %v2522_v17 = vpop.f32.mrb[31].mxu1  ;;  %v2528_v41 = vadd.f32 %v3232_v16, %v2951_v47 }
0x12e3   : > { %v2523_v19 = vadd.f32 %v2951_v47, %v2522_v17 }
0x12e4   : > { %v2605_v33 = vsel %vm2601_vm6, %v2528_v41, %v2578_v20 }
0x12e5   : > { %v2604_v24 = vsel %vm2601_vm6, %v2523_v19, %v2576_v44  ;;  %v4468_v21 = vsel %vm2612_vm7, %v2605_v33, -inf }
0x12e6   : > { %v4463_v58 = vsel %vm2612_vm7, %v2604_v24, -inf }
0x12e7   : > { %2627 = vmax.xlane.f32.xlu0 %v4463_v58 }
0x12e9   : > { %v3235_v63 = vpop.f32.mrb[32].mxu1 }
0x12ea   : > { %v2538_v59 = vadd.f32 %v3235_v63, %v2951_v47  ;;  %v2532_v60 = vpop.f32.mrb[33].mxu1 }
0x12eb   : > { %v2533_v32 = vadd.f32 %v2951_v47, %v2532_v60  ;;  %2629 = vmax.xlane.f32.xlu0 %v4468_v21 }
0x12ec   : > { %v2607_v28 = vsel %vm2601_vm6, %v2538_v59, %v2582_v5 }
0x12ed   : > { %v4473_v39 = vsel %vm2612_vm7, %v2607_v28, -inf  ;;  %v2606_v55 = vsel %vm2601_vm6, %v2533_v32, %v2580_v42 }
0x12ee   : > { %v4477_v43 = vsel %vm2612_vm7, %v2606_v55, -inf }
0x12ef   : > { %2633 = vmax.xlane.f32.xlu0 %v4473_v39  ;;  %2631 = vmax.xlane.f32.xlu1 %v4477_v43 }
0x12f1   : > { %v3238_v6 = vpop.f32.mrb[34].mxu1 }
0x12f2   : > { %v2548_v15 = vadd.f32 %v3238_v6, %v2951_v47  ;;  %v2542_v23 = vpop.f32.mrb[35].mxu1 }
0x12f3   : > { %v2543_v31 = vadd.f32 %v2951_v47, %v2542_v23 }
0x12f4   : > { %v2609_v36 = vsel %vm2601_vm6, %v2548_v15, %v2586_v52 }
0x12f5   : > { %v4483_v25 = vsel %vm2612_vm7, %v2609_v36, -inf  ;;  %v2608_v51 = vsel %vm2601_vm6, %v2543_v31, %v2584_v61 }
0x12f6   : > { %2637 = vmax.xlane.f32.xlu0 %v4483_v25  ;;  %v4488_v13 = vsel %vm2612_vm7, %v2608_v51, -inf }
0x12f7   : > { %2635 = vmax.xlane.f32.xlu1 %v4488_v13 }
0x12f9   : > { %v3241_v22 = vpop.f32.mrb[36].mxu1 }
0x12fa   : > { %v2558_v27 = vadd.f32 %v3241_v22, %v2951_v47  ;;  %v2552_v35 = vpop.f32.mrb[37].mxu1 }
0x12fb   : > { %v2553_v49 = vadd.f32 %v2951_v47, %v2552_v35 }
0x12fc   : > { %v2611_v3 = vsel %vm2601_vm6, %v2558_v27, %v2590_v7 }
0x12fd   : > { %v4493_v18 = vsel %vm2612_vm7, %v2611_v3, -inf  ;;  %v2610_v54 = vsel %vm2601_vm6, %v2553_v49, %v2588_v53 }
0x12fe   : > { %2641 = vmax.xlane.f32.xlu0 %v4493_v18  ;;  %v4498_v37 = vsel %vm2612_vm7, %v2610_v54, -inf }
0x12ff   : > { %2639 = vmax.xlane.f32.xlu1 %v4498_v37 }
0x136b   : > { %v4501_v10 = vpop.xlane.xlu1 %2625 }
0x136c   : > { %v2644_v1 = vsub.f32 %v4453_v0, %v4501_v10  ;;  %v4505_v40 = vpop.xlane.xlu0 %2623 }
0x136d   : > { %v2643_v62 = vsub.f32 %v4458_v14, %v4505_v40 }
0x136e   : > { %v2655_v12 = vmul.f32 1.442695, %v2644_v1 }
0x136f   : > { %v2653_v45 = vmul.f32 1.442695, %v2643_v62 }
0x1370   : > { %3567 = vpow2.f32 %v2655_v12 }
0x1371   : > { %3569 = vpow2.f32 %v2653_v45 }
0x1374   : > { %v4509_v11 = vpop.xlane.xlu0 %2627 }
0x1375   : > { %v2645_v38 = vsub.f32 %v4463_v58, %v4509_v11 }
0x1377   : > { %v2657_v57 = vmul.f32 1.442695, %v2645_v38 }
0x1378   : > { %v4513_v4 = vpop.xlane.xlu0 %2629 }
0x1379   : > { %3571 = vpow2.f32 %v2657_v57  ;;  %v2646_v56 = vsub.f32 %v4468_v21, %v4513_v4 }
0x137a   : > { %v3568_v50 = vpop.eup %3567 }
0x137b   : > { %v3570_v8 = vpop.eup %3569  ;;  %v2659_v47 = vmul.f32 1.442695, %v2646_v56  ;;  %2675 = vadd.xlane.f32.xlu0 %v3568_v50 }
0x137c   : > { %v4517_v48 = vpop.xlane.xlu1 %2631  ;;  %2673 = vadd.xlane.f32.xlu1 %v3570_v8  ;;  %v4519_v29 = vpop.xlane.xlu0 %2633 }
0x137d   : > { %3573 = vpow2.f32 %v2659_v47  ;;  %v2647_v30 = vsub.f32 %v4477_v43, %v4517_v48  ;;  %v2648_v2 = vsub.f32 %v4473_v39, %v4519_v29 }
0x137f   : > { %v2661_v34 = vmul.f32 1.442695, %v2647_v30  ;;  %v2663_v26 = vmul.f32 1.442695, %v2648_v2 }
0x1381   : > { %3575 = vpow2.f32 %v2661_v34 }
0x1382   : > { %3577 = vpow2.f32 %v2663_v26 }
0x1383   : > { %v3572_v46 = vpop.eup %3571  ;;  %v4525_v9 = vpop.xlane.xlu0 %2637 }
0x1384   : > { %v2650_v16 = vsub.f32 %v4483_v25, %v4525_v9  ;;  %v4529_v17 = vpop.xlane.xlu1 %2635  ;;  %2677 = vadd.xlane.f32.xlu1 %v3572_v46 }
0x1385   : > { %v2649_v41 = vsub.f32 %v4488_v13, %v4529_v17 }
0x1386   : > { %v2667_v19 = vmul.f32 1.442695, %v2650_v16 }
0x1387   : > { %v3574_v44 = vpop.eup %3573  ;;  %v2665_v20 = vmul.f32 1.442695, %v2649_v41 }
0x1388   : > { %3579 = vpow2.f32 %v2667_v19  ;;  %2679 = vadd.xlane.f32.xlu0 %v3574_v44 }
0x1389   : > { %3581 = vpow2.f32 %v2665_v20 }
0x138b   : > { %v3576_v24 = vpop.eup %3575  ;;  %v4533_v33 = vpop.xlane.xlu0 %2641 }
0x138c   : > { %v3578_v63 = vpop.eup %3577  ;;  %v2652_v59 = vsub.f32 %v4493_v18, %v4533_v33  ;;  %v4537_v60 = vpop.xlane.xlu1 %2639  ;;  %2681 = vadd.xlane.f32.xlu1 %v3576_v24 }
0x138d   : > { %v2651_v5 = vsub.f32 %v4498_v37, %v4537_v60  ;;  %2683 = vadd.xlane.f32.xlu0 %v3578_v63 }
0x138e   : > { %v2671_v32 = vmul.f32 1.442695, %v2652_v59 }
0x138f   : > { %v2669_v42 = vmul.f32 1.442695, %v2651_v5 }
0x1390   : > { %3583 = vpow2.f32 %v2671_v32 }
0x1391   : > { %3585 = vpow2.f32 %v2669_v42 }
0x1392   : > { %v3580_v28 = vpop.eup %3579 }
0x1393   : > { %v3582_v55 = vpop.eup %3581  ;;  %2687 = vadd.xlane.f32.xlu0 %v3580_v28 }
0x1394   : > { %2685 = vadd.xlane.f32.xlu1 %v3582_v55 }
0x139a   : > { %v3584_v6 = vpop.eup %3583 }
0x139b   : > { %v3586_v15 = vpop.eup %3585  ;;  %2691 = vadd.xlane.f32.xlu0 %v3584_v6 }
0x139c   : > { %2689 = vadd.xlane.f32.xlu1 %v3586_v15 }
0x1408   : > { %v2676_v23 = vpop.xlane.xlu0 %2675 }
0x1409   : > { %3587 = vlog2.f32 %v2676_v23  ;;  %v2674_v52 = vpop.xlane.xlu1 %2673 }
0x140a   : > { %3589 = vlog2.f32 %v2674_v52 }
0x1411   : > { %v2678_v31 = vpop.xlane.xlu1 %2677 }
0x1412   : > { %3591 = vlog2.f32 %v2678_v31 }
0x1413   : > { %v3588_v61 = vpop.eup %3587 }
0x1414   : > { %v3590_v36 = vpop.eup %3589  ;;  %v2696_v51 = vmul.f32 0.6931472, %v3588_v61 }
0x1415   : > { %v2694_v22 = vmul.f32 0.6931472, %v3590_v36  ;;  %v2680_v27 = vpop.xlane.xlu0 %2679 }
0x1416   : > { %v2714_v35 = vadd.f32 %v2696_v51, %v4501_v10  ;;  %3593 = vlog2.f32 %v2680_v27 }
0x1417   : > { %v2713_v7 = vadd.f32 %v2694_v22, %v4505_v40 }
0x1418   : > { %v2724_v49 = vsub.f32 %v4453_v0, %v2714_v35 }
0x1419   : > { %v2723_v53 = vsub.f32 %v4458_v14, %v2713_v7  ;;  %v2682_v3 = vpop.xlane.xlu1 %2681 }
0x141a   : > { %2734 = vst [vmem:[%s4546_s19 + $0x8] sm:$0xff] %v2724_v49  ;;  %3595 = vlog2.f32 %v2682_v3  ;;  %v2684_v54 = vpop.xlane.xlu0 %2683 }
0x141b   : > { %2733 = vst [vmem:[%s4546_s19] sm:$0xff] %v2723_v53  ;;  %3597 = vlog2.f32 %v2684_v54 }
0x141c   : > { %v3592_v10 = vpop.eup %3591 }
0x141d   : > { %v2698_v1 = vmul.f32 0.6931472, %v3592_v10 }
0x141f   : > { %v2715_v62 = vadd.f32 %v2698_v1, %v4509_v11 }
0x1420   : > { %v3594_v12 = vpop.eup %3593  ;;  %v2688_v45 = vpop.xlane.xlu0 %2687 }
0x1421   : > { %v2725_v40 = vsub.f32 %v4463_v58, %v2715_v62  ;;  %v2700_v38 = vmul.f32 0.6931472, %v3594_v12  ;;  %3599 = vlog2.f32 %v2688_v45  ;;  %v2686_v0 = vpop.xlane.xlu1 %2685 }
0x1422   : > { %3601 = vlog2.f32 %v2686_v0 }
0x1423   : > { %2735 = vst [vmem:[%s4546_s19 + $0x10] sm:$0xff] %v2725_v40  ;;  %v2716_v14 = vadd.f32 %v2700_v38, %v4513_v4 }
0x1424   : > { %v3596_v57 = vpop.eup %3595 }
0x1425   : > { %v3598_v56 = vpop.eup %3597  ;;  %v2726_v50 = vsub.f32 %v4468_v21, %v2716_v14  ;;  %v2702_v8 = vmul.f32 0.6931472, %v3596_v57 }
0x1426   : > { %v2704_v47 = vmul.f32 0.6931472, %v3598_v56 }
0x1427   : > { %2736 = vst [vmem:[%s4546_s19 + $0x18] sm:$0xff] %v2726_v50  ;;  %v2717_v11 = vadd.f32 %v2702_v8, %v4517_v48 }
0x1428   : > { %v2718_v58 = vadd.f32 %v2704_v47, %v4519_v29  ;;  %v2692_v30 = vpop.xlane.xlu0 %2691 }
0x1429   : > { %v2727_v2 = vsub.f32 %v4477_v43, %v2717_v11  ;;  %3603 = vlog2.f32 %v2692_v30  ;;  %v2690_v4 = vpop.xlane.xlu1 %2689 }
0x142a   : > { %v2728_v34 = vsub.f32 %v4473_v39, %v2718_v58  ;;  %3605 = vlog2.f32 %v2690_v4 }
0x142b   : > { %v3600_v26 = vpop.eup %3599  ;;  %2737 = vst [vmem:[%s4546_s19 + $0x20] sm:$0xff] %v2727_v2 }
0x142c   : > { %v3602_v21 = vpop.eup %3601  ;;  %2738 = vst [vmem:[%s4546_s19 + $0x28] sm:$0xff] %v2728_v34  ;;  %v2708_v46 = vmul.f32 0.6931472, %v3600_v26 }
0x142d   : > { %v2706_v16 = vmul.f32 0.6931472, %v3602_v21 }
0x142e   : > { %v2720_v48 = vadd.f32 %v2708_v46, %v4525_v9 }
0x142f   : > { %v2719_v29 = vadd.f32 %v2706_v16, %v4529_v17 }
0x1430   : > { %v2730_v43 = vsub.f32 %v4483_v25, %v2720_v48 }
0x1431   : > { %v2729_v41 = vsub.f32 %v4488_v13, %v2719_v29 }
0x1432   : > { %2740 = vst [vmem:[%s4546_s19 + $0x38] sm:$0xff] %v2730_v43 }
0x1433   : > { %v3604_v19 = vpop.eup %3603  ;;  %2739 = vst [vmem:[%s4546_s19 + $0x30] sm:$0xff] %v2729_v41 }
0x1434   : > { %v3606_v39 = vpop.eup %3605  ;;  %v2712_v44 = vmul.f32 0.6931472, %v3604_v19 }
0x1435   : > { %v2710_v20 = vmul.f32 0.6931472, %v3606_v39 }
0x1436   : > { %v2722_v24 = vadd.f32 %v2712_v44, %v4533_v33 }
0x1437   : > { %v2721_v63 = vadd.f32 %v2710_v20, %v4537_v60 }
0x1438   : > { %v2732_v59 = vsub.f32 %v4493_v18, %v2722_v24 }
0x1439   : > { %v2731_v9 = vsub.f32 %v4498_v37, %v2721_v63 }
0x143a   : > { %2742 = vst [vmem:[%s4546_s19 + $0x48] sm:$0xff] %v2732_v59 }
0x143b   : > { %2741 = vst [vmem:[%s4546_s19 + $0x40] sm:$0xff] %v2731_v9 }
0x143c PF: > { %s27_s24 = sadd.s32 1, %s3613_s24  }
0x143d   : > { %p24_p4 = scmp.ge.s32.totalorder %s27_s24, 5  }
0x143f   :  { %26 = sbr.rel (!%p24_p4) target bundleno = 3 (0x3), region = 142 }

</bundles_post_ra>
